<compile_context>
chip_gen: v6e
topology: v6e:2x2x1
jax: 0.10.0
libtpu: 0.0.40
codegen_flags: <defaults>
</compile_context>

<pallas_src>
import functools

import jax
import jax.numpy as jnp
from jax.experimental import pallas as pl
from jax.experimental.pallas import tpu as pltpu


def _round_up(x, m):
    return ((x + m - 1) // m) * m


def _choose_tk(K, hidden, dtype_bytes, max_slab_bytes=6 * 1024 * 1024):
    """Pick the K-tile: minimal zero-padding of K, fewest grid steps, and a
    streamed w1 slab small enough that two buffers fit easily in VMEM on all
    generations (v5e/v6e 128 MiB, v7x 64 MiB)."""
    K128 = _round_up(K, 128)
    tk_cap = max(128, (max_slab_bytes // (hidden * dtype_bytes)) // 128 * 128)
    if K128 <= tk_cap:
        return K128                        # single step, zero K-pad waste
    n_k = -(-K128 // tk_cap)               # fewest steps under the slab cap
    return _round_up(-(-K // n_k), 128)    # minimal per-step padding


def encoder_kernel(x_ref, w1_ref, b1_ref, w2_ref, b2_ref, gamma_ref, beta_ref,
                   wh_ref, bh_ref, eps_ref, z_ref, acc_ref,
                   *, true_b, latent_pad, block_k):
    k = pl.program_id(0)

    @pl.when(k == 0)
    def _init():
        acc_ref[...] = jnp.zeros_like(acc_ref)

    # K-tiled first matmul: one (tk, H) slab of w1 per grid step (the only
    # streamed operand, double-buffered by BlockSpec).  x is resident; slice
    # the matching 128-aligned column block.  bf16 inputs, f32 accumulation.
    start = pl.multiple_of(k * block_k, 128)
    x_blk = x_ref[:, pl.ds(start, block_k)]
    acc_ref[...] += jnp.dot(x_blk, w1_ref[...], preferred_element_type=jnp.float32)

    @pl.when(k == pl.num_programs(0) - 1)
    def _finalize():
        # Linear(D, H) bias + LeakyReLU(0.2)
        h = acc_ref[...] + b1_ref[...]
        h = jnp.where(h > 0, h, 0.2 * h)

        # Linear(H, H)  (w2 kept f32: it is small, keeps numerics tight)
        h = jnp.dot(h.astype(w2_ref.dtype), w2_ref[...],
                    preferred_element_type=jnp.float32) + b2_ref[...]

        # BatchNorm1d(H), training mode: per-batch mean, biased variance,
        # eps=1e-5.  Batch is zero-padded to a sublane multiple, so mask out
        # padded rows and divide by the TRUE batch size.
        row_ids = jax.lax.broadcasted_iota(jnp.int32, h.shape, 0)
        mask = (row_ids < true_b).astype(jnp.float32)
        inv_b = 1.0 / float(true_b)
        mean = jnp.sum(h * mask, axis=0, keepdims=True) * inv_b
        centered = (h - mean) * mask
        var = jnp.sum(centered * centered, axis=0, keepdims=True) * inv_b
        h = (h - mean) * jax.lax.rsqrt(var + 1e-5)
        h = h * gamma_ref[...] + beta_ref[...]

        # LeakyReLU(0.2)
        h = jnp.where(h > 0, h, 0.2 * h)

        # Fused (mu | logvar) head: single lane-dense (H, 2*latent_pad) matmul.
        # Padded weight/bias columns are zero => padded logvar = 0, exp = 1,
        # nothing bad leaks into the (sliced-off) padded lanes.
        ml = jnp.dot(h.astype(wh_ref.dtype), wh_ref[...],
                     preferred_element_type=jnp.float32) + bh_ref[...]
        mu = ml[:, :latent_pad]
        logvar = ml[:, latent_pad:]

        # Reparameterization (exp runs on the EUP, hidden under the schedule).
        std = jnp.exp(logvar * 0.5)
        z_ref[...] = eps_ref[...] * std + mu


def prepare_params(params, *, weights_dtype=jnp.bfloat16, block_k=None):
    """One-time parameter preparation, hoisted out of the forward path:
    pad + cast the streamed w1, fuse the mu|logvar head into one lane-dense
    matrix, and choose the K tiling."""
    (w1, b1, w2, b2, gamma, beta, wmu, bmu, wlv, blv) = params
    K, H = w1.shape
    latent = wmu.shape[1]
    Lp = _round_up(latent, 128)

    dtype_bytes = jnp.dtype(weights_dtype).itemsize
    if block_k is None:
        tk = _choose_tk(K, H, dtype_bytes)
    else:
        tk = min(_round_up(block_k, 128), _round_up(K, 128))
    K_pad = _round_up(K, tk)

    w1_p = jnp.pad(w1, ((0, K_pad - K), (0, 0))).astype(weights_dtype)

    wh = jnp.zeros((H, 2 * Lp), jnp.float32)
    wh = wh.at[:, :latent].set(wmu)
    wh = wh.at[:, Lp:Lp + latent].set(wlv)
    bh = jnp.zeros((1, 2 * Lp), jnp.float32)
    bh = bh.at[:, :latent].set(bmu)
    bh = bh.at[:, Lp:Lp + latent].set(blv)

    return {
        "arrays": (w1_p, b1, w2, b2, gamma, beta, wh, bh),
        "tk": int(tk),
        "true_k": int(K),
    }


@functools.partial(jax.jit, static_argnames=("tk",))
def _encoder_forward(img, eps, w1_p, b1, w2, b2, gamma, beta, wh, bh, *, tk):
    B = img.shape[0]
    x = img.reshape(B, -1)                    # same as torch .view(B, -1)
    K = x.shape[1]
    K_pad, H = w1_p.shape
    latent = eps.shape[1]
    Lp = wh.shape[1] // 2
    B_pad = _round_up(B, 8)                   # sublane-aligned batch
    n_k = K_pad // tk
    weights_dtype = w1_p.dtype

    # Only the small per-call tensors are padded/cast here; the 46 MB weight
    # prep lives in prepare_params (one-time).
    x_p = jnp.pad(x, ((0, B_pad - B), (0, K_pad - K))).astype(weights_dtype)
    eps_p = jnp.pad(eps.astype(jnp.float32), ((0, B_pad - B), (0, Lp - latent)))

    kernel = functools.partial(encoder_kernel,
                               true_b=B, latent_pad=Lp, block_k=tk)

    grid_spec = pltpu.PrefetchScalarGridSpec(
        num_scalar_prefetch=0,
        grid=(n_k,),
        in_specs=[
            pl.BlockSpec((B_pad, K_pad), lambda k: (0, 0)),   # x (resident)
            pl.BlockSpec((tk, H), lambda k: (k, 0)),          # w1 slab (streamed)
            pl.BlockSpec((1, H), lambda k: (0, 0)),           # b1
            pl.BlockSpec((H, H), lambda k: (0, 0)),           # w2 (resident)
            pl.BlockSpec((1, H), lambda k: (0, 0)),           # b2
            pl.BlockSpec((1, H), lambda k: (0, 0)),           # gamma
            pl.BlockSpec((1, H), lambda k: (0, 0)),           # beta
            pl.BlockSpec((H, 2 * Lp), lambda k: (0, 0)),      # fused mu|logvar W
            pl.BlockSpec((1, 2 * Lp), lambda k: (0, 0)),      # fused mu|logvar b
            pl.BlockSpec((B_pad, Lp), lambda k: (0, 0)),      # eps (lane-dense)
        ],
        out_specs=pl.BlockSpec((B_pad, Lp), lambda k: (0, 0)),
        scratch_shapes=[pltpu.VMEM((B_pad, H), jnp.float32)],  # f32 accumulator
    )

    z_pad = pl.pallas_call(
        kernel,
        out_shape=jax.ShapeDtypeStruct((B_pad, Lp), jnp.float32),
        grid_spec=grid_spec,
        compiler_params=pltpu.CompilerParams(
            dimension_semantics=("arbitrary",),               # K is a reduction
            vmem_limit_bytes=48 * 1024 * 1024,                # fits v7x 64 MiB
        ),
    )(x_p, w1_p, b1, w2, b2, gamma, beta, wh, bh, eps_p)

    return z_pad[:B, :latent]


def encoder_forward(img, eps, prep):
    """img: (B, C, H, W) float32; eps: (B, latent) float32; prep: prepare_params()."""
    return _encoder_forward(img, eps, *prep["arrays"], tk=prep["tk"])


def init_params(key, in_features, hidden, latent):
    """Deterministic PyTorch-style init: U(-1/sqrt(fan_in), 1/sqrt(fan_in))."""
    def linear(key, fan_in, fan_out):
        k = 1.0 / jnp.sqrt(jnp.float32(fan_in))
        kw, kb = jax.random.split(key)
        w = jax.random.uniform(kw, (fan_in, fan_out), jnp.float32, -k, k)
        b = jax.random.uniform(kb, (1, fan_out), jnp.float32, -k, k)
        return w, b

    k1, k2, k3, k4 = jax.random.split(key, 4)
    w1, b1 = linear(k1, in_features, hidden)
    w2, b2 = linear(k2, hidden, hidden)
    gamma = jnp.ones((1, hidden), jnp.float32)        # BatchNorm1d affine init
    beta = jnp.zeros((1, hidden), jnp.float32)
    wmu, bmu = linear(k3, hidden, latent)
    wlv, blv = linear(k4, hidden, latent)
    return (w1, b1, w2, b2, gamma, beta, wmu, bmu, wlv, blv)


def reference_forward(img, params, eps, *, first_layer_dtype=jnp.float32):
    """Pure-JAX reference (training-mode BatchNorm).  `first_layer_dtype`
    lets the reference match the kernel's streamed-weight precision (bf16)
    while keeping f32 accumulation, so the comparison stays tight."""
    (w1, b1, w2, b2, gamma, beta, wmu, bmu, wlv, blv) = params
    x = img.reshape(img.shape[0], -1)
    h = jnp.dot(x.astype(first_layer_dtype), w1.astype(first_layer_dtype),
                preferred_element_type=jnp.float32) + b1
    h = jnp.where(h > 0, h, 0.2 * h)
    h = h @ w2 + b2
    mean = jnp.mean(h, axis=0, keepdims=True)
    var = jnp.mean((h - mean) ** 2, axis=0, keepdims=True)
    h = (h - mean) / jnp.sqrt(var + 1e-5) * gamma + beta
    h = jnp.where(h > 0, h, 0.2 * h)
    mu = h @ wmu + bmu
    logvar = h @ wlv + blv
    return eps * jnp.exp(logvar / 2) + mu


if __name__ == "__main__":
    # Small shapes consistent with the module structure:
    # channels=1, img_size=16 (original is 150), hidden=512, latent_dim=60.
    # NOTE: larger batches amortize the streamed weight and are supported by
    # the same tiling (B_pad scales automatically).
    B, C, Himg, Wimg = 4, 1, 16, 16
    hidden, latent = 512, 60
    D = C * Himg * Wimg

    key = jax.random.PRNGKey(0)
    k_img, k_eps, k_par = jax.random.split(key, 3)

    img = jax.random.normal(k_img, (B, C, Himg, Wimg), jnp.float32)
    eps = jax.random.normal(k_eps, (B, latent), jnp.float32)   # sampled_z
    params = init_params(k_par, D, hidden, latent)

    # One-time parameter prep (hoisted out of the forward path): pad + cast w1
    # to bf16, fuse the mu|logvar head, pick the K tiling.  block_k=128 forces
    # the toy size (D=256) through the multi-step K pipeline; at the real image
    # size (D=22500) the default auto-picks tk=5632 (n_k=4, K_pad=22528).
    prep = prepare_params(params, weights_dtype=jnp.bfloat16, block_k=128)

    z = encoder_forward(img, eps, prep)
    z = jax.block_until_ready(z)
    assert z.shape == (B, latent)

    # Compare against a reference that matches the kernel's bf16 first-layer
    # precision (f32 accumulation on both sides).
    z_ref = reference_forward(img, params, eps, first_layer_dtype=jnp.bfloat16)
    assert jnp.allclose(z, z_ref, atol=2e-3, rtol=2e-3), "mismatch vs JAX reference"

    # Sanity check against the full-f32 reference with relaxed tolerance
    # (expected bf16-level error on the first matmul only).
    z_ref_f32 = reference_forward(img, params, eps)
    assert jnp.allclose(z, z_ref_f32, atol=5e-2, rtol=5e-2), "far from f32 reference"

    print("KERNEL_OK")
</pallas_src>

<mosaic_0001>
module attributes {stable_mosaic.version = 11 : i64} {
  func.func @encoder_kernel(%arg0: i32, %arg1: memref<8x256xbf16, #tpu.memory_space<vmem>>, %arg2: memref<128x512xbf16, #tpu.memory_space<vmem>>, %arg3: memref<1x512xf32, #tpu.memory_space<vmem>>, %arg4: memref<512x512xf32, #tpu.memory_space<vmem>>, %arg5: memref<1x512xf32, #tpu.memory_space<vmem>>, %arg6: memref<1x512xf32, #tpu.memory_space<vmem>>, %arg7: memref<1x512xf32, #tpu.memory_space<vmem>>, %arg8: memref<512x256xf32, #tpu.memory_space<vmem>>, %arg9: memref<1x256xf32, #tpu.memory_space<vmem>>, %arg10: memref<8x128xf32, #tpu.memory_space<vmem>>, %arg11: memref<8x128xf32, #tpu.memory_space<vmem>>, %arg12: memref<8x512xf32, #tpu.memory_space<vmem>>) attributes {dimension_semantics = [#tpu.dimension_semantics<arbitrary>], iteration_bounds = array<i64: 2>, scalar_prefetch = 0 : i64, scratch_operands = 1 : i64, tpu.core_type = #tpu.core_type<tc>, window_params = [{pipeline_mode = #tpu.pipeline_mode<synchronous>, transform_indices = @transform_0, window_bounds = array<i64: 8, 256>}, {transform_indices = @transform_1, window_bounds = array<i64: 128, 512>}, {pipeline_mode = #tpu.pipeline_mode<synchronous>, transform_indices = @transform_2, window_bounds = array<i64: 1, 512>}, {pipeline_mode = #tpu.pipeline_mode<synchronous>, transform_indices = @transform_3, window_bounds = array<i64: 512, 512>}, {pipeline_mode = #tpu.pipeline_mode<synchronous>, transform_indices = @transform_4, window_bounds = array<i64: 1, 512>}, {pipeline_mode = #tpu.pipeline_mode<synchronous>, transform_indices = @transform_5, window_bounds = array<i64: 1, 512>}, {pipeline_mode = #tpu.pipeline_mode<synchronous>, transform_indices = @transform_6, window_bounds = array<i64: 1, 512>}, {pipeline_mode = #tpu.pipeline_mode<synchronous>, transform_indices = @transform_7, window_bounds = array<i64: 512, 256>}, {pipeline_mode = #tpu.pipeline_mode<synchronous>, transform_indices = @transform_8, window_bounds = array<i64: 1, 256>}, {pipeline_mode = #tpu.pipeline_mode<synchronous>, transform_indices = @transform_9, window_bounds = array<i64: 8, 128>}, {pipeline_mode = #tpu.pipeline_mode<synchronous>, transform_indices = @transform_10, window_bounds = array<i64: 8, 128>}]} {
    %c0_i32 = arith.constant 0 : i32
    %0 = arith.cmpi eq, %arg0, %c0_i32 : i32
    %1 = arith.extui %0 : i1 to i32
    %c0_i32_0 = arith.constant 0 : i32
    %2 = arith.cmpi ne, %1, %c0_i32_0 : i32
    scf.if %2 {
      %cst_8 = arith.constant 0.000000e+00 : f32
      %15 = vector.broadcast %cst_8 : f32 to vector<8x512xf32>
      %c0_9 = arith.constant 0 : index
      %c0_10 = arith.constant 0 : index
      %16 = vector.load %arg12[%c0_9, %c0_10] : memref<8x512xf32, #tpu.memory_space<vmem>>, vector<8x512xf32>
      tpu.vector_store %arg12[%c0_9, %c0_10], %15 {strides = array<i32>} : memref<8x512xf32, #tpu.memory_space<vmem>>, vector<8x512xf32>,
    } else {
    }
    %c128_i32 = arith.constant 128 : i32
    %3 = arith.muli %arg0, %c128_i32 : i32
    %4 = tpu.assume_multiple %3, 128 : i32
    %c0 = arith.constant 0 : index
    %5 = arith.index_cast %4 : i32 to index
    %6 = vector.load %arg1[%c0, %5] : memref<8x256xbf16, #tpu.memory_space<vmem>>, vector<8x128xbf16>
    %c0_1 = arith.constant 0 : index
    %c0_2 = arith.constant 0 : index
    %7 = vector.load %arg12[%c0_1, %c0_2] : memref<8x512xf32, #tpu.memory_space<vmem>>, vector<8x512xf32>
    %c0_3 = arith.constant 0 : index
    %c0_4 = arith.constant 0 : index
    %8 = vector.load %arg2[%c0_3, %c0_4] : memref<128x512xbf16, #tpu.memory_space<vmem>>, vector<128x512xbf16>
    %cst = arith.constant dense<0.000000e+00> : vector<8x512xf32>
    %9 = tpu.matmul %6, %8, %cst {dimension_numbers = #tpu.dot_dimension_numbers<[1], [0], [0], [1], [0, 0, 1, 1], [], []>} : vector<8x128xbf16>, vector<128x512xbf16>, vector<8x512xf32> -> vector<8x512xf32>
    %10 = arith.addf %7, %9 : vector<8x512xf32>
    %c0_5 = arith.constant 0 : index
    %c0_6 = arith.constant 0 : index
    %11 = vector.load %arg12[%c0_5, %c0_6] : memref<8x512xf32, #tpu.memory_space<vmem>>, vector<8x512xf32>
    tpu.vector_store %arg12[%c0_5, %c0_6], %10 {strides = array<i32>} : memref<8x512xf32, #tpu.memory_space<vmem>>, vector<8x512xf32>,
    %c1_i32 = arith.constant 1 : i32
    %12 = arith.cmpi eq, %arg0, %c1_i32 : i32
    %13 = arith.extui %12 : i1 to i32
    %c0_i32_7 = arith.constant 0 : i32
    %14 = arith.cmpi ne, %13, %c0_i32_7 : i32
    scf.if %14 {
      %c0_8 = arith.constant 0 : index
      %c0_9 = arith.constant 0 : index
      %15 = vector.load %arg12[%c0_8, %c0_9] : memref<8x512xf32, #tpu.memory_space<vmem>>, vector<8x512xf32>
      %c0_10 = arith.constant 0 : index
      %c0_11 = arith.constant 0 : index
      %16 = vector.load %arg3[%c0_10, %c0_11] : memref<1x512xf32, #tpu.memory_space<vmem>>, vector<1x512xf32>
      %17 = vector.broadcast %16 : vector<1x512xf32> to vector<8x512xf32>
      %18 = arith.addf %15, %17 : vector<8x512xf32>
      %cst_12 = arith.constant 0.000000e+00 : f32
      %19 = vector.broadcast %cst_12 : f32 to vector<8x512xf32>
      %20 = arith.cmpf ogt, %18, %19 : vector<8x512xf32>
      %cst_13 = arith.constant 2.000000e-01 : f32
      %21 = vector.broadcast %cst_13 : f32 to vector<8x512xf32>
      %22 = arith.mulf %21, %18 : vector<8x512xf32>
      %23 = arith.select %20, %18, %22 : vector<8x512xi1>, vector<8x512xf32>
      %c0_14 = arith.constant 0 : index
      %c0_15 = arith.constant 0 : index
      %24 = vector.load %arg4[%c0_14, %c0_15] : memref<512x512xf32, #tpu.memory_space<vmem>>, vector<512x512xf32>
      %cst_16 = arith.constant dense<0.000000e+00> : vector<8x512xf32>
      %25 = tpu.matmul %23, %24, %cst_16 {dimension_numbers = #tpu.dot_dimension_numbers<[1], [0], [0], [1], [0, 0, 1, 1], [], []>} : vector<8x512xf32>, vector<512x512xf32>, vector<8x512xf32> -> vector<8x512xf32>
      %c0_17 = arith.constant 0 : index
      %c0_18 = arith.constant 0 : index
      %26 = vector.load %arg5[%c0_17, %c0_18] : memref<1x512xf32, #tpu.memory_space<vmem>>, vector<1x512xf32>
      %27 = vector.broadcast %26 : vector<1x512xf32> to vector<8x512xf32>
      %28 = arith.addf %25, %27 : vector<8x512xf32>
      %29 = tpu.iota {dimensions = array<i32: 0>} : vector<8x512xi32>
      %c4_i32 = arith.constant 4 : i32
      %30 = vector.broadcast %c4_i32 : i32 to vector<8x512xi32>
      %31 = arith.cmpi slt, %29, %30 : vector<8x512xi32>
      %32 = arith.extui %31 : vector<8x512xi1> to vector<8x512xi32>
      %33 = arith.sitofp %32 : vector<8x512xi32> to vector<8x512xf32>
      %34 = arith.mulf %28, %33 : vector<8x512xf32>
      %cst_19 = arith.constant dense<0.000000e+00> : vector<512xf32>
      %35 = vector.multi_reduction <add>, %34, %cst_19 [0] : vector<8x512xf32> to vector<512xf32>
      %36 = vector.shape_cast %35 : vector<512xf32> to vector<1x512xf32>
      %cst_20 = arith.constant 2.500000e-01 : f32
      %37 = vector.broadcast %cst_20 : f32 to vector<1x512xf32>
      %38 = arith.mulf %36, %37 : vector<1x512xf32>
      %39 = vector.broadcast %38 : vector<1x512xf32> to vector<8x512xf32>
      %40 = arith.subf %28, %39 : vector<8x512xf32>
      %41 = arith.mulf %40, %33 : vector<8x512xf32>
      %42 = arith.mulf %41, %41 : vector<8x512xf32>
      %cst_21 = arith.constant dense<0.000000e+00> : vector<512xf32>
      %43 = vector.multi_reduction <add>, %42, %cst_21 [0] : vector<8x512xf32> to vector<512xf32>
      %44 = vector.shape_cast %43 : vector<512xf32> to vector<1x512xf32>
      %cst_22 = arith.constant 2.500000e-01 : f32
      %45 = vector.broadcast %cst_22 : f32 to vector<1x512xf32>
      %46 = arith.mulf %44, %45 : vector<1x512xf32>
      %47 = vector.broadcast %38 : vector<1x512xf32> to vector<8x512xf32>
      %48 = arith.subf %28, %47 : vector<8x512xf32>
      %cst_23 = arith.constant 9.99999974E-6 : f32
      %49 = vector.broadcast %cst_23 : f32 to vector<1x512xf32>
      %50 = arith.addf %46, %49 : vector<1x512xf32>
      %51 = math.rsqrt %50 : vector<1x512xf32>
      %52 = vector.broadcast %51 : vector<1x512xf32> to vector<8x512xf32>
      %53 = arith.mulf %48, %52 : vector<8x512xf32>
      %c0_24 = arith.constant 0 : index
      %c0_25 = arith.constant 0 : index
      %54 = vector.load %arg6[%c0_24, %c0_25] : memref<1x512xf32, #tpu.memory_space<vmem>>, vector<1x512xf32>
      %55 = vector.broadcast %54 : vector<1x512xf32> to vector<8x512xf32>
      %56 = arith.mulf %53, %55 : vector<8x512xf32>
      %c0_26 = arith.constant 0 : index
      %c0_27 = arith.constant 0 : index
      %57 = vector.load %arg7[%c0_26, %c0_27] : memref<1x512xf32, #tpu.memory_space<vmem>>, vector<1x512xf32>
      %58 = vector.broadcast %57 : vector<1x512xf32> to vector<8x512xf32>
      %59 = arith.addf %56, %58 : vector<8x512xf32>
      %cst_28 = arith.constant 0.000000e+00 : f32
      %60 = vector.broadcast %cst_28 : f32 to vector<8x512xf32>
      %61 = arith.cmpf ogt, %59, %60 : vector<8x512xf32>
      %cst_29 = arith.constant 2.000000e-01 : f32
      %62 = vector.broadcast %cst_29 : f32 to vector<8x512xf32>
      %63 = arith.mulf %62, %59 : vector<8x512xf32>
      %64 = arith.select %61, %59, %63 : vector<8x512xi1>, vector<8x512xf32>
      %c0_30 = arith.constant 0 : index
      %c0_31 = arith.constant 0 : index
      %65 = vector.load %arg8[%c0_30, %c0_31] : memref<512x256xf32, #tpu.memory_space<vmem>>, vector<512x256xf32>
      %cst_32 = arith.constant dense<0.000000e+00> : vector<8x256xf32>
      %66 = tpu.matmul %64, %65, %cst_32 {dimension_numbers = #tpu.dot_dimension_numbers<[1], [0], [0], [1], [0, 0, 1, 1], [], []>} : vector<8x512xf32>, vector<512x256xf32>, vector<8x256xf32> -> vector<8x256xf32>
      %c0_33 = arith.constant 0 : index
      %c0_34 = arith.constant 0 : index
      %67 = vector.load %arg9[%c0_33, %c0_34] : memref<1x256xf32, #tpu.memory_space<vmem>>, vector<1x256xf32>
      %68 = vector.broadcast %67 : vector<1x256xf32> to vector<8x256xf32>
      %69 = arith.addf %66, %68 : vector<8x256xf32>
      %70 = vector.extract_strided_slice %69 {offsets = [0, 0], sizes = [8, 128], strides = [1, 1]} : vector<8x256xf32> to vector<8x128xf32>
      %71 = vector.extract_strided_slice %69 {offsets = [0, 128], sizes = [8, 128], strides = [1, 1]} : vector<8x256xf32> to vector<8x128xf32>
      %cst_35 = arith.constant 5.000000e-01 : f32
      %72 = vector.broadcast %cst_35 : f32 to vector<8x128xf32>
      %73 = arith.mulf %71, %72 : vector<8x128xf32>
      %74 = math.exp %73 : vector<8x128xf32>
      %c0_36 = arith.constant 0 : index
      %c0_37 = arith.constant 0 : index
      %75 = vector.load %arg10[%c0_36, %c0_37] : memref<8x128xf32, #tpu.memory_space<vmem>>, vector<8x128xf32>
      %76 = arith.mulf %75, %74 : vector<8x128xf32>
      %77 = arith.addf %76, %70 : vector<8x128xf32>
      %c0_38 = arith.constant 0 : index
      %c0_39 = arith.constant 0 : index
      %78 = vector.load %arg11[%c0_38, %c0_39] : memref<8x128xf32, #tpu.memory_space<vmem>>, vector<8x128xf32>
      tpu.vector_store %arg11[%c0_38, %c0_39], %77 {strides = array<i32>} : memref<8x128xf32, #tpu.memory_space<vmem>>, vector<8x128xf32>,
    } else {
    }
    return
  }
  func.func @transform_0(%arg0: i32) -> (i32, i32) {
    %c0_i32 = arith.constant 0 : i32
    %c0_i32_0 = arith.constant 0 : i32
    %c0_i32_1 = arith.constant 0 : i32
    return %c0_i32, %c0_i32_0 : i32, i32
  }
  func.func @transform_1(%arg0: i32) -> (i32, i32) {
    %c0_i32 = arith.constant 0 : i32
    %c0_i32_0 = arith.constant 0 : i32
    return %arg0, %c0_i32 : i32, i32
  }
  func.func @transform_2(%arg0: i32) -> (i32, i32) {
    %c0_i32 = arith.constant 0 : i32
    %c0_i32_0 = arith.constant 0 : i32
    %c0_i32_1 = arith.constant 0 : i32
    return %c0_i32, %c0_i32_0 : i32, i32
  }
  func.func @transform_3(%arg0: i32) -> (i32, i32) {
    %c0_i32 = arith.constant 0 : i32
    %c0_i32_0 = arith.constant 0 : i32
    %c0_i32_1 = arith.constant 0 : i32
    return %c0_i32, %c0_i32_0 : i32, i32
  }
  func.func @transform_4(%arg0: i32) -> (i32, i32) {
    %c0_i32 = arith.constant 0 : i32
    %c0_i32_0 = arith.constant 0 : i32
    %c0_i32_1 = arith.constant 0 : i32
    return %c0_i32, %c0_i32_0 : i32, i32
  }
  func.func @transform_5(%arg0: i32) -> (i32, i32) {
    %c0_i32 = arith.constant 0 : i32
    %c0_i32_0 = arith.constant 0 : i32
    %c0_i32_1 = arith.constant 0 : i32
    return %c0_i32, %c0_i32_0 : i32, i32
  }
  func.func @transform_6(%arg0: i32) -> (i32, i32) {
    %c0_i32 = arith.constant 0 : i32
    %c0_i32_0 = arith.constant 0 : i32
    %c0_i32_1 = arith.constant 0 : i32
    return %c0_i32, %c0_i32_0 : i32, i32
  }
  func.func @transform_7(%arg0: i32) -> (i32, i32) {
    %c0_i32 = arith.constant 0 : i32
    %c0_i32_0 = arith.constant 0 : i32
    %c0_i32_1 = arith.constant 0 : i32
    return %c0_i32, %c0_i32_0 : i32, i32
  }
  func.func @transform_8(%arg0: i32) -> (i32, i32) {
    %c0_i32 = arith.constant 0 : i32
    %c0_i32_0 = arith.constant 0 : i32
    %c0_i32_1 = arith.constant 0 : i32
    return %c0_i32, %c0_i32_0 : i32, i32
  }
  func.func @transform_9(%arg0: i32) -> (i32, i32) {
    %c0_i32 = arith.constant 0 : i32
    %c0_i32_0 = arith.constant 0 : i32
    %c0_i32_1 = arith.constant 0 : i32
    return %c0_i32, %c0_i32_0 : i32, i32
  }
  func.func @transform_10(%arg0: i32) -> (i32, i32) {
    %c0_i32 = arith.constant 0 : i32
    %c0_i32_0 = arith.constant 0 : i32
    %c0_i32_1 = arith.constant 0 : i32
    return %c0_i32, %c0_i32_0 : i32, i32
  }
}

</mosaic_0001>

<bundles_post_ra>
// kernel: _encoder_forward.1
= control target key start
LH: loop header
LB: loop body
LE: loop exit
PB: predicated region body
PF: predicated region fallthrough
CT: control target
= control target key end

     0   :  { %15 = vsyncpa [#allocation4], 0  ;;  %s2451_s0 = inlined_call_operand.vmem [shape: bf16[8,256], index: 0, kind: input, shape index: {}]   ;;  %s2452_s1 = inlined_call_operand.hbm [shape: bf16[256,512], index: 1, kind: input, shape index: {}]   ;;  %s2453_s2 = inlined_call_operand.vmem [shape: f32[1,512], index: 2, kind: input, shape index: {}]   ;;  %s2454_s3 = inlined_call_operand.hbm [shape: f32[512,512], index: 3, kind: input, shape index: {}]   ;;  %s2455_s4 = inlined_call_operand.vmem [shape: f32[1,512], index: 4, kind: input, shape index: {}]   ;;  %s2456_s5 = inlined_call_operand.vmem [shape: f32[1,512], index: 5, kind: input, shape index: {}]   ;;  %s2457_s6 = inlined_call_operand.vmem [shape: f32[1,512], index: 6, kind: input, shape index: {}]   ;;  %s2458_s7 = inlined_call_operand.hbm [shape: f32[512,256], index: 7, kind: input, shape index: {}]   ;;  %s2459_s8 = inlined_call_operand.vmem [shape: f32[1,256], index: 8, kind: input, shape index: {}]   ;;  %s2460_s9 = inlined_call_operand.vmem [shape: f32[8,128], index: 9, kind: input, shape index: {}]   ;;  %s2461_s10 = inlined_call_operand.vmem [shape: f32[8,128], index: 10, kind: output, shape index: {}]  }
   0x1   :  { %17 = vsyncpa [#allocation4 + $0x1], 0 }
   0x2   :  { %18 = vsyncpa [#allocation6], 0  ;;  %s2171_s13 = smov 0   ;;  %s2173_s14 = smov 0  }
   0x3   :  { %s2175_s15 = smov 0   ;;  %s2177_s16 = smov 0  }
   0x4 LB: > { %s2190_s17 = sadd.s32 4294967295, %s2104_s16   ;;  %p65_p0 = scmp.ne.s32.totalorder %s2096_s14, %s2092_s13  ;;  %s2104_s16 = sphi %s2177_s16, %s2481_s16   ;;  %s2100_s15 = sphi %s2175_s15, %s2480_s15   ;;  %s2096_s14 = sphi %s2173_s14, %s2479_s14   ;;  %s2092_s13 = sphi %s2171_s13, %s2478_s13  }
   0x5   : > { %p2462_p1 = scmp.eq.s32.totalorder %s2190_s17, 0  ;;  %p1808_p2 = scmp.ge.s32.totalorder %s2104_s16, 1 }
   0x6   : > { %p265_p3 = scmp.lt.s32.totalorder %s2104_s16, 3  ;;  %s2106_s20 = smov [#allocation5]  }
   0x7   : > { %p2199_p5 = por %p2462_p1, %p65_p0  ;;  %s283_s21 = sshll.u32 %s2106_s20, 4  ;;  %s284_s21 = int_to_ptr.vmem [resolvable:$true] %s283_s21 }
   0x8   : > { %p2203_p6 = pnand %p1808_p2, %p265_p3  ;;  %s2107_s23 = smov [#allocation7]  }
   0x9   : > { %s2467_s18 = scalar_select %p2199_p5, 1, 0 }
   0xa   : > { %s2468_s19 = scalar_select %p2203_p6, 1, 0 }
   0xb   : > { %p1871_p7 = pneg %p2203_p6  ;;  %s305_s24 = sshll.u32 %s2107_s23, 4  ;;  %s306_s24 = int_to_ptr.vmem [resolvable:$true] %s305_s24 }
   0xc   : > { %s1997_s25 = scalar_lea.vmem %s284_s21, 32768  ;;  %p2005_p13 = scmp.lt.s32.totalorder %s284_s21, %s284_s21 }
   0xd   : > { %p2211_p8 = pnand %p1871_p7, %p2462_p1  ;;  %p1998_p10 = scmp.ne.s32.totalorder %s284_s21, %s1997_s25 }
   0xe   : > { %p2006_p0 = scmp.lt.s32.totalorder %s1997_s25, %s1997_s25 }
   0xf   : > { %p1988_p9 = pneg %p2211_p8 }
  0x10   : > { %p2007_p2 = por %p2006_p0, %p2005_p13 }
  0x11   : > { %p2000_p11 = pnand %p1998_p10, %p1988_p9 }
  0x13   : > { %p2001_p12 = pneg %p2000_p11 }
  0x15   : > { %p2008_p3 = pnand %p2007_p2, %p2001_p12 }
  0x17   : > { %2011 = shalt.err (!%p2008_p3)
}
  0x18   : > { %s2108_s26 = smov 512   ;;  %s2109_s27 = smov 32  }
  0x19   : > { %1874 = dma.hbm_to_vmem [thread:$0]  (!%p2211_p8), %s2454_s3, 32768, %s284_s21, [#allocation6], %s2108_s26, %s2108_s26, %s2109_s27  }
  0x1a   : > { %s2023_s30 = scalar_lea.vmem %s306_s24, 16384  ;;  %p2031_p4 = scmp.lt.s32.totalorder %s306_s24, %s306_s24 }
  0x1b   : > { %p2024_p7 = scmp.ne.s32.totalorder %s306_s24, %s2023_s30  ;;  %p2032_p1 = scmp.lt.s32.totalorder %s2023_s30, %s2023_s30 }
  0x1d   : > { %p2026_p10 = pnand %p2024_p7, %p1988_p9  ;;  %p2033_p13 = por %p2032_p1, %p2031_p4 }
  0x1f   : > { %p2027_p11 = pneg %p2026_p10 }
  0x21   : > { %p2034_p12 = pnand %p2033_p13, %p2027_p11 }
  0x23   : > { %2037 = shalt.err (!%p2034_p12)
}
  0x24   : > { %s2463_s11 = smov 256   ;;  %s2464_s12 = smov 16  }
  0x25   : > { %1877 = dma.hbm_to_vmem [thread:$0]  (!%p2211_p8), %s2458_s7, 16384, %s306_s24, [#allocation6], %s2463_s11, %s2463_s11, %s2464_s12  }
  0x26   : > { %s2237_s21 = sadd.s32 1, %s2104_s16   ;;  %s52_s25 = sadd.s32 1, %s2100_s15 }
  0x27   : > { %s49_s23 = ssub.s32 %s2104_s16, %s2237_s21  ;;  %p59_p4 = scmp.ne.s32.totalorder %s2100_s15, %s2096_s14 }
  0x28   : > { %p50_p1 = scmp.eq.s32.totalorder %s49_s23, 0  ;;  %p60_p9 = scmp.eq.s32.totalorder %s2104_s16, 0 }
  0x29   : > { %p1884_p2 = scmp.lt.s32.totalorder %s2104_s16, 2  ;;  %s325_s22 = sand.u32 1, %s2100_s15  }
  0x2a   : > { %s2246_s26 = scalar_select %p50_p1, %s2100_s15, %s52_s25  }
  0x2b   : > { %p61_p0 = por %p60_p9, %p59_p4  ;;  %s1860_s27 = sshll.u32 %s2104_s16, 12 }
  0x2c   : > { %s1812_s28 = sshll.u32 %s325_s22, 8  ;;  %s2254_s13 = scalar_lea.hbm %s2452_s1, %s1860_s27 }
  0x2d   : > { %s329_s24 = scalar_lea.vmem [#allocation3], %s1812_s28  ;;  %p2256_p8 = pnand %p1884_p2, %p61_p0 }
  0x2e   : > { %s337_s20 = sshll.u32 %s329_s24, 4  ;;  %s2262_s25 = scalar_lea.sflag [#allocation4], %s325_s22  ;;  %s2260_s20 = int_to_ptr.vmem [resolvable:$true] %s337_s20 }
  0x2f   : > { %s2038_s16 = scalar_lea.hbm %s2254_s13, 4096  ;;  %p2040_p7 = pneg %p2256_p8 }
  0x30   : > { %p2039_p3 = scmp.ne.s32.totalorder %s2254_s13, %s2038_s16  ;;  %s2043_s28 = scalar_lea.hbm %s2452_s1, 8192 }
  0x31   : > { %p2044_p13 = scmp.lt.s32.totalorder %s2254_s13, %s2452_s1  ;;  %p2045_p12 = scmp.lt.s32.totalorder %s2043_s28, %s2038_s16 }
  0x32   : > { %p2041_p10 = pnand %p2040_p7, %p2039_p3 }
  0x33   : > { %p2046_p1 = por %p2045_p12, %p2044_p13 }
  0x34   : > { %p2042_p11 = pneg %p2041_p10 }
  0x36   : > { %p2047_p4 = pnand %p2046_p1, %p2042_p11 }
  0x38   : > { %2050 = shalt.err (!%p2047_p4)
}
  0x39   : > { %s2051_s22 = scalar_lea.vmem %s2260_s20, 4096  ;;  %s2112_s11 = smov [#allocation3]  }
  0x3a   : > { %p2052_p9 = scmp.ne.s32.totalorder %s2260_s20, %s2051_s22  ;;  %s2056_s12 = sshll.u32 %s2112_s11, 4  ;;  %s2057_s12 = int_to_ptr.vmem [resolvable:$false] %s2056_s12 }
  0x3b   : > { %s2058_s27 = scalar_lea.vmem %s2057_s12, 8192  ;;  %p2059_p3 = scmp.lt.s32.totalorder %s2260_s20, %s2057_s12 }
  0x3c   : > { %p2054_p0 = pnand %p2052_p9, %p2040_p7  ;;  %p2060_p10 = scmp.lt.s32.totalorder %s2058_s27, %s2051_s22 }
  0x3e   : > { %p2055_p2 = pneg %p2054_p0  ;;  %p2061_p5 = por %p2060_p10, %p2059_p3 }
  0x40   : > { %p2062_p6 = pnand %p2061_p5, %p2055_p2 }
  0x42   : > { %2065 = shalt.err (!%p2062_p6)
}
  0x43   : > { %s2471_s16 = smov 16   ;;  %s2472_s29 = smov 256  }
  0x44   : > { %1881 = dma.hbm_to_vmem [thread:$0]  (!%p2256_p8), %s2254_s13, 4096, %s2260_s20, %s2262_s25, %s2472_s29, %s2472_s29, %s2471_s16  }
  0x45   : > { %p2473_p7 = scmp.ne.s32.totalorder %s2468_s19, 0 }
  0x46   : > { %s351_s11 = sand.u32 (!%p2473_p7), 1, %s2096_s14   ;;  %p2474_p5 = scmp.ne.s32.totalorder (!%p2473_p7), %s2467_s18, 0 }
  0x47   : > { %349 = sbr.rel (%p2473_p7) target bundleno = 937 (0x3a9), region = 60  ;;  %s1817_s12 = sshll.u32 (!%p2473_p7), %s351_s11, 8 }
  0x48   : > { %s352_s28 = scalar_lea.sflag (!%p2473_p7), [#allocation4], %s351_s11  ;;  %s2289_s30 = scalar_lea.vmem (!%p2473_p7), [#allocation3], %s1817_s12 }
  0x4c   : > { %2083 = dma.done.wait (%p2474_p5), %s352_s28, 4096  }
  0x4d   : > { %2085 = vsyncadd (%p2474_p5), %s352_s28, 4294963200  ;;  %p2475_p6 = scmp.eq.s32.totalorder %s2190_s17, 0 }
  0x4f   : > { %2087 = dma.done.wait (%p2475_p6), [#allocation6], 49152   ;;  %p2476_p8 = pmov %p2475_p6 }
  0x50   : > { %p2477_p11 = scmp.ne.s32.totalorder %s2190_s17, 0 }
  0x51   : > { %2089 = vsyncadd (%p2476_p8), [#allocation6], 4294918144 }
  0x52   : > { %400 = sbr.rel (%p2477_p11) target bundleno = 90 (0x5a), region = 76 }
  0x57   : > { %v2113_v0 = vmov 0.0  }
  0x58   : > { %401 = vst [vmem:[#allocation2 + $0x10] sm:$0xff] %v2113_v0  ;;  %402 = vst [vmem:[#allocation2] sm:$0xff] %v2113_v0 }
  0x59   : > { %403 = vst [vmem:[#allocation2 + $0x18] sm:$0xff] %v2113_v0  ;;  %404 = vst [vmem:[#allocation2 + $0x8] sm:$0xff] %v2113_v0 }
  0x5a PF: > { %v1928_v1 = vld [vmem:[%s2289_s30 + $0xe4] ss:$16 sps:$4 sm:$0xff]   ;;  %v1930_v2 = vld [vmem:[%s2289_s30 + $0xec] ss:$16 sps:$4 sm:$0xff]   ;;  %v2114_v3 = vmov 0   ;;  %s1821_s18 = sshll.u32 %s2190_s17, 7 }
  0x5b   : > { %639 = vmatprep.mubr.bf16.mxu0 %v2114_v3  ;;  %680 = vmatprep.mubr.bf16.mxu1 %v2114_v3  ;;  %v1932_v4 = vld [vmem:[%s2289_s30 + $0xe0] ss:$16 sps:$4 sm:$0xff]   ;;  %v1933_v5 = vld [vmem:[%s2289_s30 + $0xe8] ss:$16 sps:$4 sm:$0xff]   ;;  %v1934_v6 = vld [vmem:[%s2289_s30 + $0xc4] ss:$16 sps:$4 sm:$0xff]  }
  0x5c   : > { %607 = vmatprep.subr.bf16.mxu0 %v1928_v1  ;;  %648 = vmatprep.subr.bf16.mxu1 %v1930_v2  ;;  %v1936_v7 = vld [vmem:[%s2289_s30 + $0xcc] ss:$16 sps:$4 sm:$0xff]   ;;  %v1938_v8 = vld [vmem:[%s2289_s30 + $0xc0] ss:$16 sps:$4 sm:$0xff]   ;;  %v1939_v9 = vld [vmem:[%s2289_s30 + $0xc8] ss:$16 sps:$4 sm:$0xff]  }
  0x5d   : > { %608 = vmatpush1.bf16.msra.mxu0 %v1932_v4  ;;  %649 = vmatpush1.bf16.msra.mxu1 %v1933_v5  ;;  %v1940_v10 = vld [vmem:[%s2289_s30 + $0xa4] ss:$16 sps:$4 sm:$0xff]   ;;  %v1942_v11 = vld [vmem:[%s2289_s30 + $0xac] ss:$16 sps:$4 sm:$0xff]   ;;  %v1944_v12 = vld [vmem:[%s2289_s30 + $0xa0] ss:$16 sps:$4 sm:$0xff]  }
  0x5e   : > { %609 = vmatprep.subr.bf16.mxu0 %v1934_v6  ;;  %650 = vmatprep.subr.bf16.mxu1 %v1936_v7  ;;  %v1945_v13 = vld [vmem:[%s2289_s30 + $0xa8] ss:$16 sps:$4 sm:$0xff]   ;;  %v1946_v14 = vld [vmem:[%s2289_s30 + $0x84] ss:$16 sps:$4 sm:$0xff]   ;;  %v1948_v15 = vld [vmem:[%s2289_s30 + $0x8c] ss:$16 sps:$4 sm:$0xff]  }
  0x5f   : > { %v1950_v16 = vld [vmem:[%s2289_s30 + $0x80] ss:$16 sps:$4 sm:$0xff]   ;;  %v1951_v17 = vld [vmem:[%s2289_s30 + $0x88] ss:$16 sps:$4 sm:$0xff]   ;;  %v1952_v18 = vld [vmem:[%s2289_s30 + $0x64] ss:$16 sps:$4 sm:$0xff]  }
  0x60   : > { %v1954_v19 = vld [vmem:[%s2289_s30 + $0x6c] ss:$16 sps:$4 sm:$0xff]   ;;  %v1956_v20 = vld [vmem:[%s2289_s30 + $0x60] ss:$16 sps:$4 sm:$0xff]   ;;  %v1957_v21 = vld [vmem:[%s2289_s30 + $0x68] ss:$16 sps:$4 sm:$0xff]  }
  0x61   : > { %610 = vmatpush1.bf16.msra.mxu0 %v1938_v8  ;;  %651 = vmatpush1.bf16.msra.mxu1 %v1939_v9  ;;  %v1958_v22 = vld [vmem:[%s2289_s30 + $0x44] ss:$16 sps:$4 sm:$0xff]   ;;  %v1960_v23 = vld [vmem:[%s2289_s30 + $0x4c] ss:$16 sps:$4 sm:$0xff]   ;;  %v1962_v24 = vld [vmem:[%s2289_s30 + $0x40] ss:$16 sps:$4 sm:$0xff]  }
  0x62   : > { %611 = vmatprep.subr.bf16.mxu0 %v1940_v10  ;;  %652 = vmatprep.subr.bf16.mxu1 %v1942_v11  ;;  %v1963_v25 = vld [vmem:[%s2289_s30 + $0x48] ss:$16 sps:$4 sm:$0xff]   ;;  %v1964_v26 = vld [vmem:[%s2289_s30 + $0x24] ss:$16 sps:$4 sm:$0xff]   ;;  %v1966_v27 = vld [vmem:[%s2289_s30 + $0x2c] ss:$16 sps:$4 sm:$0xff]  }
  0x63   : > { %s406_s19 = sshra.s32 %s1821_s18, 7  ;;  %v1968_v28 = vld [vmem:[%s2289_s30 + $0x20] ss:$16 sps:$4 sm:$0xff]   ;;  %v1969_v29 = vld [vmem:[%s2289_s30 + $0x28] ss:$16 sps:$4 sm:$0xff]   ;;  %p1855_p13 = scmp.ne.s32.totalorder %s2190_s17, 1 }
  0x64   : > { %v1970_v30 = vld [vmem:[%s2289_s30 + $0x4] ss:$16 sps:$4 sm:$0xff]   ;;  %v1972_v31 = vld [vmem:[%s2289_s30 + $0xc] ss:$16 sps:$4 sm:$0xff]   ;;  %s1822_s13 = sshll.u32 %s406_s19, 2 }
  0x65   : > { %612 = vmatpush1.bf16.msra.mxu0 %v1944_v12  ;;  %653 = vmatpush1.bf16.msra.mxu1 %v1945_v13  ;;  %v1974_v32 = vld [vmem:[%s2289_s30] ss:$16 sps:$4 sm:$0xff]   ;;  %v1975_v33 = vld [vmem:[%s2289_s30 + $0x8] ss:$16 sps:$4 sm:$0xff]   ;;  %s409_s25 = scalar_lea.vmem %s2451_s0, %s1822_s13 }
  0x66   : > { %613 = vmatprep.subr.bf16.mxu0 %v1946_v14  ;;  %654 = vmatprep.subr.bf16.mxu1 %v1948_v15  ;;  %v410_v34 = vld [vmem:[%s409_s25] sm:$0xf]  ;;  %v411_v35 = vld [vmem:[#allocation2 + $0x10] sm:$0xff]  ;;  %v413_v36 = vld [vmem:[#allocation2 + $0x18] sm:$0xff] }
  0x67   : > { %v412_v39 = vld [vmem:[#allocation2] sm:$0xff]  ;;  %v414_v40 = vld [vmem:[#allocation2 + $0x8] sm:$0xff] }
  0x69   : > { %614 = vmatpush1.bf16.msra.mxu0 %v1950_v16  ;;  %655 = vmatpush1.bf16.msra.mxu1 %v1951_v17 }
  0x6a   : > { %615 = vmatprep.subr.bf16.mxu0 %v1952_v18  ;;  %656 = vmatprep.subr.bf16.mxu1 %v1954_v19 }
  0x6d   : > { %616 = vmatpush1.bf16.msra.mxu0 %v1956_v20  ;;  %657 = vmatpush1.bf16.msra.mxu1 %v1957_v21 }
  0x6e   : > { %617 = vmatprep.subr.bf16.mxu0 %v1958_v22  ;;  %658 = vmatprep.subr.bf16.mxu1 %v1960_v23 }
  0x71   : > { %618 = vmatpush1.bf16.msra.mxu0 %v1962_v24  ;;  %659 = vmatpush1.bf16.msra.mxu1 %v1963_v25 }
  0x72   : > { %619 = vmatprep.subr.bf16.mxu0 %v1964_v26  ;;  %660 = vmatprep.subr.bf16.mxu1 %v1966_v27 }
  0x75   : > { %620 = vmatpush1.bf16.msra.mxu0 %v1968_v28  ;;  %661 = vmatpush1.bf16.msra.mxu1 %v1969_v29 }
  0x76   : > { %621 = vmatprep.subr.bf16.mxu0 %v1970_v30  ;;  %662 = vmatprep.subr.bf16.mxu1 %v1972_v31 }
  0x79   : > { %622 = vmatpush1.bf16.msra.mxu0 %v1974_v32  ;;  %663 = vmatpush1.bf16.msra.mxu1 %v1975_v33 }
  0x7c   : > { %640 = vmatmul.mubr.bf16.vlgmr.msra.gmra.mxu0 %v410_v34  ;;  %681 = vmatmul.mubr.bf16.vlgmr.msra.gmra.mxu1 %v410_v34 }
 0x13c   : > { %v641_v37 = vpop.f32.mrf.mxu0  ;;  %v682_v38 = vpop.f32.mrf.mxu1 }
 0x13d   : > { %v689_v41 = vadd.f32 %v641_v37, %v411_v35  ;;  %v691_v42 = vadd.f32 %v682_v38, %v413_v36 }
 0x13e   : > { %v643_v43 = vpop.f32.mrf.mxu0  ;;  %v684_v44 = vpop.f32.mrf.mxu1  ;;  %700 = sbr.rel (%p1855_p13) target bundleno = 937 (0x3a9), region = 80 }
 0x13f   : > { %693 = vst [vmem:[#allocation2 + $0x10] sm:$0xff] %v689_v41  ;;  %695 = vst [vmem:[#allocation2 + $0x18] sm:$0xff] %v691_v42  ;;  %v690_v45 = vadd.f32 %v643_v43, %v412_v39  ;;  %v692_v46 = vadd.f32 %v684_v44, %v414_v40 }
 0x140   : > { %v645_v47 = vpop.f32.mrf.mxu0  ;;  %v686_v48 = vpop.f32.mrf.mxu1 }
 0x141   : > { %694 = vst [vmem:[#allocation2] sm:$0xff] %v690_v45  ;;  %696 = vst [vmem:[#allocation2 + $0x8] sm:$0xff] %v692_v46 }
 0x142   : > { %v646_v49 = vpop.f32.mrf.mxu0  ;;  %v687_v50 = vpop.f32.mrf.mxu1 }
 0x143   : > { %v804_v51 = vld [vmem:[#allocation5 + $0x1e8] sm:$0xff]  ;;  %v803_v53 = vld [vmem:[#allocation5 + $0x1e0] sm:$0xff] }
 0x144   : > { %v932_v52 = vld [vmem:[#allocation5 + $0x5e8] sm:$0xff]  ;;  %1021 = vmatprep.subr.mxu0 %v804_v51  ;;  %v931_v54 = vld [vmem:[#allocation5 + $0x5e0] sm:$0xff] }
 0x145   : > { %1092 = vmatprep.subr.mxu1 %v932_v52  ;;  %v800_v55 = vld [vmem:[#allocation5 + $0x1c8] sm:$0xff]  ;;  %1022 = vmatpush1.msra.mxu0 %v803_v53  ;;  %v799_v57 = vld [vmem:[#allocation5 + $0x1c0] sm:$0xff] }
 0x146   : > { %v928_v56 = vld [vmem:[#allocation5 + $0x5c8] sm:$0xff]  ;;  %1093 = vmatpush1.msra.mxu1 %v931_v54  ;;  %v927_v58 = vld [vmem:[#allocation5 + $0x5c0] sm:$0xff]  ;;  %1023 = vmatprep.subr.mxu0 %v800_v55 }
 0x147   : > { %v796_v59 = vld [vmem:[#allocation5 + $0x1a8] sm:$0xff]  ;;  %1094 = vmatprep.subr.mxu1 %v928_v56  ;;  %v795_v61 = vld [vmem:[#allocation5 + $0x1a0] sm:$0xff]  ;;  %1024 = vmatpush1.msra.mxu0 %v799_v57 }
 0x148   : > { %v924_v60 = vld [vmem:[#allocation5 + $0x5a8] sm:$0xff]  ;;  %v923_v62 = vld [vmem:[#allocation5 + $0x5a0] sm:$0xff]  ;;  %1095 = vmatpush1.msra.mxu1 %v927_v58  ;;  %1025 = vmatprep.subr.mxu0 %v796_v59 }
 0x149   : > { %v792_v63 = vld [vmem:[#allocation5 + $0x188] sm:$0xff]  ;;  %1096 = vmatprep.subr.mxu1 %v924_v60  ;;  %v791_v1 = vld [vmem:[#allocation5 + $0x180] sm:$0xff]  ;;  %1026 = vmatpush1.msra.mxu0 %v795_v61 }
 0x14a   : > { %v920_v0 = vld [vmem:[#allocation5 + $0x588] sm:$0xff]  ;;  %v919_v2 = vld [vmem:[#allocation5 + $0x580] sm:$0xff]  ;;  %1097 = vmatpush1.msra.mxu1 %v923_v62  ;;  %1027 = vmatprep.subr.mxu0 %v792_v63 }
 0x14b   : > { %v788_v3 = vld [vmem:[#allocation5 + $0x168] sm:$0xff]  ;;  %1098 = vmatprep.subr.mxu1 %v920_v0  ;;  %v787_v5 = vld [vmem:[#allocation5 + $0x160] sm:$0xff]  ;;  %1028 = vmatpush1.msra.mxu0 %v791_v1 }
 0x14c   : > { %v916_v4 = vld [vmem:[#allocation5 + $0x568] sm:$0xff]  ;;  %v915_v6 = vld [vmem:[#allocation5 + $0x560] sm:$0xff]  ;;  %1099 = vmatpush1.msra.mxu1 %v919_v2  ;;  %1029 = vmatprep.subr.mxu0 %v788_v3  ;;  %v707_v3 = vlaneseq }
 0x14d   : > { %v784_v7 = vld [vmem:[#allocation5 + $0x148] sm:$0xff]  ;;  %1100 = vmatprep.subr.mxu1 %v916_v4  ;;  %v783_v9 = vld [vmem:[#allocation5 + $0x140] sm:$0xff]  ;;  %1030 = vmatpush1.msra.mxu0 %v787_v5 }
 0x14e   : > { %v912_v8 = vld [vmem:[#allocation5 + $0x548] sm:$0xff]  ;;  %v911_v10 = vld [vmem:[#allocation5 + $0x540] sm:$0xff]  ;;  %1101 = vmatpush1.msra.mxu1 %v915_v6  ;;  %1031 = vmatprep.subr.mxu0 %v784_v7 }
 0x14f   : > { %v780_v11 = vld [vmem:[#allocation5 + $0x128] sm:$0xff]  ;;  %1102 = vmatprep.subr.mxu1 %v912_v8  ;;  %v779_v13 = vld [vmem:[#allocation5 + $0x120] sm:$0xff]  ;;  %1032 = vmatpush1.msra.mxu0 %v783_v9 }
 0x150   : > { %v908_v12 = vld [vmem:[#allocation5 + $0x528] sm:$0xff]  ;;  %v907_v14 = vld [vmem:[#allocation5 + $0x520] sm:$0xff]  ;;  %1103 = vmatpush1.msra.mxu1 %v911_v10  ;;  %1033 = vmatprep.subr.mxu0 %v780_v11 }
 0x151   : > { %v776_v15 = vld [vmem:[#allocation5 + $0x108] sm:$0xff]  ;;  %1104 = vmatprep.subr.mxu1 %v908_v12  ;;  %v775_v17 = vld [vmem:[#allocation5 + $0x100] sm:$0xff]  ;;  %1034 = vmatpush1.msra.mxu0 %v779_v13  ;;  %v2338_v12 = vshrl.u32 %v707_v3, 7 }
 0x152   : > { %v904_v16 = vld [vmem:[#allocation5 + $0x508] sm:$0xff]  ;;  %v903_v18 = vld [vmem:[#allocation5 + $0x500] sm:$0xff]  ;;  %1105 = vmatpush1.msra.mxu1 %v907_v14  ;;  %1035 = vmatprep.subr.mxu0 %v776_v15 }
 0x153   : > { %v772_v19 = vld [vmem:[#allocation5 + $0xe8] sm:$0xff]  ;;  %1106 = vmatprep.subr.mxu1 %v904_v16  ;;  %v771_v21 = vld [vmem:[#allocation5 + $0xe0] sm:$0xff]  ;;  %1036 = vmatpush1.msra.mxu0 %v775_v17  ;;  %vm1307_vm4 = vcmp.lt.s32.totalorder %v2338_v12, 4 }
 0x154   : > { %v900_v20 = vld [vmem:[#allocation5 + $0x4e8] sm:$0xff]  ;;  %v899_v22 = vld [vmem:[#allocation5 + $0x4e0] sm:$0xff]  ;;  %1107 = vmatpush1.msra.mxu1 %v903_v18  ;;  %1037 = vmatprep.subr.mxu0 %v772_v19 }
 0x155   : > { %v768_v23 = vld [vmem:[#allocation5 + $0xc8] sm:$0xff]  ;;  %1108 = vmatprep.subr.mxu1 %v900_v20  ;;  %v767_v25 = vld [vmem:[#allocation5 + $0xc0] sm:$0xff]  ;;  %1038 = vmatpush1.msra.mxu0 %v771_v21  ;;  %v2341_v21 = vsub.s32 1, %v2338_v12 }
 0x156   : > { %v896_v24 = vld [vmem:[#allocation5 + $0x4c8] sm:$0xff]  ;;  %v895_v26 = vld [vmem:[#allocation5 + $0x4c0] sm:$0xff]  ;;  %1109 = vmatpush1.msra.mxu1 %v899_v22  ;;  %1039 = vmatprep.subr.mxu0 %v768_v23 }
 0x157   : > { %v764_v27 = vld [vmem:[#allocation5 + $0xa8] sm:$0xff]  ;;  %1110 = vmatprep.subr.mxu1 %v896_v24  ;;  %v763_v29 = vld [vmem:[#allocation5 + $0xa0] sm:$0xff]  ;;  %1040 = vmatpush1.msra.mxu0 %v767_v25  ;;  %v2347_v25 = vsub.s32 0, %v2338_v12 }
 0x158   : > { %v892_v28 = vld [vmem:[#allocation5 + $0x4a8] sm:$0xff]  ;;  %v891_v30 = vld [vmem:[#allocation5 + $0x4a0] sm:$0xff]  ;;  %1111 = vmatpush1.msra.mxu1 %v895_v26  ;;  %1041 = vmatprep.subr.mxu0 %v764_v27 }
 0x159   : > { %v760_v31 = vld [vmem:[#allocation5 + $0x88] sm:$0xff]  ;;  %1112 = vmatprep.subr.mxu1 %v892_v28  ;;  %v759_v33 = vld [vmem:[#allocation5 + $0x80] sm:$0xff]  ;;  %1042 = vmatpush1.msra.mxu0 %v763_v29  ;;  %v2350_v28 = vsub.s32 3, %v2338_v12 }
 0x15a   : > { %v888_v32 = vld [vmem:[#allocation5 + $0x488] sm:$0xff]  ;;  %v887_v34 = vld [vmem:[#allocation5 + $0x480] sm:$0xff]  ;;  %1113 = vmatpush1.msra.mxu1 %v891_v30  ;;  %1043 = vmatprep.subr.mxu0 %v760_v31  ;;  %v2353_v31 = vsub.s32 2, %v2338_v12  ;;  %v1556_v12 = vld [vmem:[#allocation7 + $0x310] sm:$0xff] }
 0x15b   : > { %v756_v35 = vld [vmem:[#allocation5 + $0x68] sm:$0xff]  ;;  %1114 = vmatprep.subr.mxu1 %v888_v32  ;;  %v755_v37 = vld [vmem:[#allocation5 + $0x60] sm:$0xff]  ;;  %1044 = vmatpush1.msra.mxu0 %v759_v33 }
 0x15c   : > { %v884_v36 = vld [vmem:[#allocation5 + $0x468] sm:$0xff]  ;;  %v883_v38 = vld [vmem:[#allocation5 + $0x460] sm:$0xff]  ;;  %1115 = vmatpush1.msra.mxu1 %v887_v34  ;;  %1045 = vmatprep.subr.mxu0 %v756_v35 }
 0x15d   : > { %v752_v39 = vld [vmem:[#allocation5 + $0x48] sm:$0xff]  ;;  %1116 = vmatprep.subr.mxu1 %v884_v36  ;;  %v751_v41 = vld [vmem:[#allocation5 + $0x40] sm:$0xff]  ;;  %1046 = vmatpush1.msra.mxu0 %v755_v37 }
 0x15e   : > { %v880_v40 = vld [vmem:[#allocation5 + $0x448] sm:$0xff]  ;;  %v879_v42 = vld [vmem:[#allocation5 + $0x440] sm:$0xff]  ;;  %1117 = vmatpush1.msra.mxu1 %v883_v38  ;;  %1047 = vmatprep.subr.mxu0 %v752_v39 }
 0x15f   : > { %v748_v43 = vld [vmem:[#allocation5 + $0x28] sm:$0xff]  ;;  %1118 = vmatprep.subr.mxu1 %v880_v40  ;;  %v747_v45 = vld [vmem:[#allocation5 + $0x20] sm:$0xff]  ;;  %1048 = vmatpush1.msra.mxu0 %v751_v41  ;;  %v701_v41 = vld [vmem:[#allocation2 + $0x10] sm:$0xff] }
 0x160   : > { %v876_v44 = vld [vmem:[#allocation5 + $0x428] sm:$0xff]  ;;  %v875_v46 = vld [vmem:[#allocation5 + $0x420] sm:$0xff]  ;;  %1119 = vmatpush1.msra.mxu1 %v879_v42  ;;  %1049 = vmatprep.subr.mxu0 %v748_v43 }
 0x161   : > { %v744_v47 = vld [vmem:[#allocation5 + $0x8] sm:$0xff]  ;;  %1120 = vmatprep.subr.mxu1 %v876_v44  ;;  %v743_v49 = vld [vmem:[#allocation5] sm:$0xff]  ;;  %1050 = vmatpush1.msra.mxu0 %v747_v45 }
 0x162   : > { %v872_v48 = vld [vmem:[#allocation5 + $0x408] sm:$0xff]  ;;  %v871_v50 = vld [vmem:[#allocation5 + $0x400] sm:$0xff]  ;;  %1121 = vmatpush1.msra.mxu1 %v875_v46  ;;  %1051 = vmatprep.subr.mxu0 %v744_v47 }
 0x163   : > { %v868_v51 = vld [vmem:[#allocation5 + $0x3e8] sm:$0xff]  ;;  %1122 = vmatprep.subr.mxu1 %v872_v48  ;;  %v867_v53 = vld [vmem:[#allocation5 + $0x3e0] sm:$0xff]  ;;  %1052 = vmatpush1.msra.mxu0 %v743_v49 }
 0x164   : > { %v996_v52 = vld [vmem:[#allocation5 + $0x7e8] sm:$0xff]  ;;  %v995_v54 = vld [vmem:[#allocation5 + $0x7e0] sm:$0xff]  ;;  %1123 = vmatpush1.msra.mxu1 %v871_v50  ;;  %1053 = vmatprep.subr.mxu0 %v868_v51  ;;  %v703_v50 = vld [vmem:[#allocation2 + $0x18] sm:$0xff] }
 0x165   : > { %v864_v55 = vld [vmem:[#allocation5 + $0x3c8] sm:$0xff]  ;;  %1124 = vmatprep.subr.mxu1 %v996_v52  ;;  %v863_v57 = vld [vmem:[#allocation5 + $0x3c0] sm:$0xff]  ;;  %1054 = vmatpush2.msra.mxu0 %v867_v53 }
 0x166   : > { %v992_v56 = vld [vmem:[#allocation5 + $0x7c8] sm:$0xff]  ;;  %v991_v58 = vld [vmem:[#allocation5 + $0x7c0] sm:$0xff]  ;;  %1125 = vmatpush2.msra.mxu1 %v995_v54  ;;  %1055 = vmatprep.subr.mxu0 %v864_v55 }
 0x167   : > { %v860_v59 = vld [vmem:[#allocation5 + $0x3a8] sm:$0xff]  ;;  %1126 = vmatprep.subr.mxu1 %v992_v56  ;;  %v859_v61 = vld [vmem:[#allocation5 + $0x3a0] sm:$0xff]  ;;  %1056 = vmatpush2.msra.mxu0 %v863_v57 }
 0x168   : > { %v988_v60 = vld [vmem:[#allocation5 + $0x7a8] sm:$0xff]  ;;  %v987_v62 = vld [vmem:[#allocation5 + $0x7a0] sm:$0xff]  ;;  %1127 = vmatpush2.msra.mxu1 %v991_v58  ;;  %1057 = vmatprep.subr.mxu0 %v860_v59 }
 0x169   : > { %v856_v63 = vld [vmem:[#allocation5 + $0x388] sm:$0xff]  ;;  %1128 = vmatprep.subr.mxu1 %v988_v60  ;;  %v855_v1 = vld [vmem:[#allocation5 + $0x380] sm:$0xff]  ;;  %1058 = vmatpush2.msra.mxu0 %v859_v61 }
 0x16a   : > { %v984_v0 = vld [vmem:[#allocation5 + $0x788] sm:$0xff]  ;;  %v983_v2 = vld [vmem:[#allocation5 + $0x780] sm:$0xff]  ;;  %1129 = vmatpush2.msra.mxu1 %v987_v62  ;;  %1059 = vmatprep.subr.mxu0 %v856_v63 }
 0x16b   : > { %v852_v4 = vld [vmem:[#allocation5 + $0x368] sm:$0xff]  ;;  %1130 = vmatprep.subr.mxu1 %v984_v0  ;;  %v851_v6 = vld [vmem:[#allocation5 + $0x360] sm:$0xff]  ;;  %1060 = vmatpush2.msra.mxu0 %v855_v1 }
 0x16c   : > { %v980_v5 = vld [vmem:[#allocation5 + $0x768] sm:$0xff]  ;;  %v979_v7 = vld [vmem:[#allocation5 + $0x760] sm:$0xff]  ;;  %1131 = vmatpush2.msra.mxu1 %v983_v2  ;;  %1061 = vmatprep.subr.mxu0 %v852_v4 }
 0x16d   : > { %v848_v8 = vld [vmem:[#allocation5 + $0x348] sm:$0xff]  ;;  %1132 = vmatprep.subr.mxu1 %v980_v5  ;;  %v847_v10 = vld [vmem:[#allocation5 + $0x340] sm:$0xff]  ;;  %1062 = vmatpush2.msra.mxu0 %v851_v6 }
 0x16e   : > { %v976_v9 = vld [vmem:[#allocation5 + $0x748] sm:$0xff]  ;;  %v975_v11 = vld [vmem:[#allocation5 + $0x740] sm:$0xff]  ;;  %1133 = vmatpush2.msra.mxu1 %v979_v7  ;;  %1063 = vmatprep.subr.mxu0 %v848_v8 }
 0x16f   : > { %v844_v13 = vld [vmem:[#allocation5 + $0x328] sm:$0xff]  ;;  %1134 = vmatprep.subr.mxu1 %v976_v9  ;;  %v843_v15 = vld [vmem:[#allocation5 + $0x320] sm:$0xff]  ;;  %1064 = vmatpush2.msra.mxu0 %v847_v10 }
 0x170   : > { %v972_v14 = vld [vmem:[#allocation5 + $0x728] sm:$0xff]  ;;  %v971_v16 = vld [vmem:[#allocation5 + $0x720] sm:$0xff]  ;;  %1135 = vmatpush2.msra.mxu1 %v975_v11  ;;  %1065 = vmatprep.subr.mxu0 %v844_v13 }
 0x171   : > { %v840_v17 = vld [vmem:[#allocation5 + $0x308] sm:$0xff]  ;;  %1136 = vmatprep.subr.mxu1 %v972_v14  ;;  %v839_v19 = vld [vmem:[#allocation5 + $0x300] sm:$0xff]  ;;  %1066 = vmatpush2.msra.mxu0 %v843_v15  ;;  %v806_v14 = vld [vmem:[#allocation5 + $0x1f8] sm:$0xff] }
 0x172   : > { %v968_v18 = vld [vmem:[#allocation5 + $0x708] sm:$0xff]  ;;  %v967_v20 = vld [vmem:[#allocation5 + $0x700] sm:$0xff]  ;;  %1137 = vmatpush2.msra.mxu1 %v971_v16  ;;  %1067 = vmatprep.subr.mxu0 %v840_v17  ;;  %v934_v15 = vld [vmem:[#allocation5 + $0x5f8] sm:$0xff] }
 0x173   : > { %v836_v22 = vld [vmem:[#allocation5 + $0x2e8] sm:$0xff]  ;;  %v705_v24 = vld [vmem:[%s2453_s2] sm:$0xf]  ;;  %1138 = vmatprep.subr.mxu1 %v968_v18  ;;  %1068 = vmatpush2.msra.mxu0 %v839_v19  ;;  %v805_v17 = vld [vmem:[#allocation5 + $0x1f0] sm:$0xff] }
 0x174   : > { %v964_v23 = vld [vmem:[#allocation5 + $0x6e8] sm:$0xff]  ;;  %v835_v26 = vld [vmem:[#allocation5 + $0x2e0] sm:$0xff]  ;;  %1139 = vmatpush2.msra.mxu1 %v967_v20  ;;  %1069 = vmatprep.subr.mxu0 %v836_v22  ;;  %v714_v34 = vrot.slane %v705_v24, %v2341_v21  ;;  %v710_v38 = vrot.slane %v705_v24, %v2347_v25  ;;  %v722_v42 = vrot.slane %v705_v24, %v2350_v28  ;;  %v933_v18 = vld [vmem:[#allocation5 + $0x5f0] sm:$0xff] }
 0x175   : > { %v963_v27 = vld [vmem:[#allocation5 + $0x6e0] sm:$0xff]  ;;  %v832_v29 = vld [vmem:[#allocation5 + $0x2c8] sm:$0xff]  ;;  %1140 = vmatprep.subr.mxu1 %v964_v23  ;;  %1070 = vmatpush2.msra.mxu0 %v835_v26  ;;  %v718_v46 = vrot.slane %v705_v24, %v2353_v31  ;;  %v802_v19 = vld [vmem:[#allocation5 + $0x1d8] sm:$0xff] }
 0x176   : > { %v960_v30 = vld [vmem:[#allocation5 + $0x6c8] sm:$0xff]  ;;  %v831_v32 = vld [vmem:[#allocation5 + $0x2c0] sm:$0xff]  ;;  %1141 = vmatpush2.msra.mxu1 %v963_v27  ;;  %1071 = vmatprep.subr.mxu0 %v832_v29  ;;  %v727_v53 = vadd.f32 %v710_v38, %v701_v41  ;;  %v930_v20 = vld [vmem:[#allocation5 + $0x5d8] sm:$0xff] }
 0x177   : > { %v959_v33 = vld [vmem:[#allocation5 + $0x6c0] sm:$0xff]  ;;  %v828_v35 = vld [vmem:[#allocation5 + $0x2a8] sm:$0xff]  ;;  %1142 = vmatprep.subr.mxu1 %v960_v30  ;;  %1072 = vmatpush2.msra.mxu0 %v831_v32  ;;  %v729_v59 = vadd.f32 %v718_v46, %v703_v50  ;;  %v801_v22 = vld [vmem:[#allocation5 + $0x1d0] sm:$0xff] }
 0x178   : > { %v956_v36 = vld [vmem:[#allocation5 + $0x6a8] sm:$0xff]  ;;  %v702_v37 = vld [vmem:[#allocation2] sm:$0xff]  ;;  %1143 = vmatpush2.msra.mxu1 %v959_v33  ;;  %1073 = vmatprep.subr.mxu0 %v828_v35  ;;  %v735_v1 = vmul.f32 0.2, %v727_v53  ;;  %vm731_vm1 = vcmp.gt.f32.partialorder %v727_v53, 0.0  ;;  %v929_v23 = vld [vmem:[#allocation5 + $0x5d0] sm:$0xff] }
 0x179   : > { %v827_v39 = vld [vmem:[#allocation5 + $0x2a0] sm:$0xff]  ;;  %v824_v43 = vld [vmem:[#allocation5 + $0x288] sm:$0xff]  ;;  %1144 = vmatprep.subr.mxu1 %v956_v36  ;;  %v728_v49 = vadd.f32 %v714_v34, %v702_v37  ;;  %v737_v7 = vmul.f32 0.2, %v729_v59  ;;  %vm733_vm3 = vcmp.gt.f32.partialorder %v729_v59, 0.0  ;;  %v798_v24 = vld [vmem:[#allocation5 + $0x1b8] sm:$0xff] }
 0x17a   : > { %v955_v40 = vld [vmem:[#allocation5 + $0x6a0] sm:$0xff]  ;;  %v952_v44 = vld [vmem:[#allocation5 + $0x688] sm:$0xff]  ;;  %1074 = vmatpush2.msra.mxu0 %v827_v39  ;;  %v2363_v11 = vsel %vm731_vm1, %v727_v53, %v735_v1  ;;  %v926_v26 = vld [vmem:[#allocation5 + $0x5b8] sm:$0xff] }
 0x17b   : > { %v704_v45 = vld [vmem:[#allocation2 + $0x8] sm:$0xff]  ;;  %v823_v47 = vld [vmem:[#allocation5 + $0x280] sm:$0xff]  ;;  %1145 = vmatpush2.msra.mxu1 %v955_v40  ;;  %1075 = vmatprep.subr.mxu0 %v824_v43  ;;  %v736_v62 = vmul.f32 0.2, %v728_v49  ;;  %vm732_vm0 = vcmp.gt.f32.partialorder %v728_v49, 0.0  ;;  %v2368_v16 = vsel %vm733_vm3, %v729_v59, %v737_v7  ;;  %v797_v27 = vld [vmem:[#allocation5 + $0x1b0] sm:$0xff] }
 0x17c   : > { %v951_v48 = vld [vmem:[#allocation5 + $0x680] sm:$0xff]  ;;  %v820_v51 = vld [vmem:[#allocation5 + $0x268] sm:$0xff]  ;;  %1146 = vmatprep.subr.mxu1 %v952_v44  ;;  %v730_v56 = vadd.f32 %v722_v42, %v704_v45  ;;  %1076 = vmatpush2.msra.mxu0 %v823_v47  ;;  %v925_v29 = vld [vmem:[#allocation5 + $0x5b0] sm:$0xff] }
 0x17d   : > { %v948_v52 = vld [vmem:[#allocation5 + $0x668] sm:$0xff]  ;;  %v819_v54 = vld [vmem:[#allocation5 + $0x260] sm:$0xff]  ;;  %1147 = vmatpush2.msra.mxu1 %v951_v48  ;;  %1077 = vmatprep.subr.mxu0 %v820_v51  ;;  %v2360_v9 = vsel %vm732_vm0, %v728_v49, %v736_v62  ;;  %v794_v30 = vld [vmem:[#allocation5 + $0x198] sm:$0xff] }
 0x17e   : > { %v947_v55 = vld [vmem:[#allocation5 + $0x660] sm:$0xff]  ;;  %v816_v57 = vld [vmem:[#allocation5 + $0x248] sm:$0xff]  ;;  %1148 = vmatprep.subr.mxu1 %v948_v52  ;;  %1078 = vmatpush2.msra.mxu0 %v819_v54  ;;  %v738_v4 = vmul.f32 0.2, %v730_v56  ;;  %vm734_vm2 = vcmp.gt.f32.partialorder %v730_v56, 0.0  ;;  %v922_v32 = vld [vmem:[#allocation5 + $0x598] sm:$0xff] }
 0x17f   : > { %v944_v58 = vld [vmem:[#allocation5 + $0x648] sm:$0xff]  ;;  %v815_v60 = vld [vmem:[#allocation5 + $0x240] sm:$0xff]  ;;  %1149 = vmatpush2.msra.mxu1 %v947_v55  ;;  %1079 = vmatprep.subr.mxu0 %v816_v57  ;;  %v793_v33 = vld [vmem:[#allocation5 + $0x190] sm:$0xff] }
 0x180   : > { %v943_v61 = vld [vmem:[#allocation5 + $0x640] sm:$0xff]  ;;  %v812_v63 = vld [vmem:[#allocation5 + $0x228] sm:$0xff]  ;;  %1150 = vmatprep.subr.mxu1 %v944_v58  ;;  %1080 = vmatpush2.msra.mxu0 %v815_v60  ;;  %v2365_v13 = vsel %vm734_vm2, %v730_v56, %v738_v4  ;;  %v921_v34 = vld [vmem:[#allocation5 + $0x590] sm:$0xff] }
 0x181   : > { %v940_v0 = vld [vmem:[#allocation5 + $0x628] sm:$0xff]  ;;  %v811_v2 = vld [vmem:[#allocation5 + $0x220] sm:$0xff]  ;;  %1151 = vmatpush2.msra.mxu1 %v943_v61  ;;  %1081 = vmatprep.subr.mxu0 %v812_v63  ;;  %v790_v35 = vld [vmem:[#allocation5 + $0x178] sm:$0xff] }
 0x182   : > { %v939_v3 = vld [vmem:[#allocation5 + $0x620] sm:$0xff]  ;;  %v808_v5 = vld [vmem:[#allocation5 + $0x208] sm:$0xff]  ;;  %1152 = vmatprep.subr.mxu1 %v940_v0  ;;  %1082 = vmatpush2.msra.mxu0 %v811_v2  ;;  %v918_v36 = vld [vmem:[#allocation5 + $0x578] sm:$0xff] }
 0x183   : > { %v936_v6 = vld [vmem:[#allocation5 + $0x608] sm:$0xff]  ;;  %v807_v8 = vld [vmem:[#allocation5 + $0x200] sm:$0xff]  ;;  %1153 = vmatpush2.msra.mxu1 %v939_v3  ;;  %1083 = vmatprep.subr.mxu0 %v808_v5  ;;  %v789_v37 = vld [vmem:[#allocation5 + $0x170] sm:$0xff] }
 0x184   : > { %v935_v10 = vld [vmem:[#allocation5 + $0x600] sm:$0xff]  ;;  %1154 = vmatprep.subr.mxu1 %v936_v6  ;;  %1084 = vmatpush2.msra.mxu0 %v807_v8  ;;  %v917_v38 = vld [vmem:[#allocation5 + $0x570] sm:$0xff]  ;;  %v786_v39 = vld [vmem:[#allocation5 + $0x158] sm:$0xff] }
 0x185   : > { %1085 = vmatprep.mubr.f32.mxu0 %v2360_v9  ;;  %1155 = vmatpush2.msra.mxu1 %v935_v10  ;;  %v914_v40 = vld [vmem:[#allocation5 + $0x558] sm:$0xff]  ;;  %v785_v41 = vld [vmem:[#allocation5 + $0x150] sm:$0xff] }
 0x186   : > { %1086 = vmatmul.mubr.f32.vlgmr.msra.gmra.mxu0 %v2363_v11  ;;  %1156 = vmatprep.mubr.f32.mxu1 %v2365_v13  ;;  %v913_v42 = vld [vmem:[#allocation5 + $0x550] sm:$0xff]  ;;  %v782_v43 = vld [vmem:[#allocation5 + $0x138] sm:$0xff] }
 0x187   : > { %1163 = vmatprep.subr.mxu0 %v806_v14  ;;  %1234 = vmatprep.subr.mxu1 %v934_v15  ;;  %v910_v44 = vld [vmem:[#allocation5 + $0x538] sm:$0xff]  ;;  %v781_v45 = vld [vmem:[#allocation5 + $0x130] sm:$0xff] }
 0x188   : > { %1157 = vmatmul.mubr.f32.vlgmr.msra.gmra.mxu1 %v2368_v16  ;;  %1164 = vmatpush1.msra.mxu0 %v805_v17  ;;  %v909_v46 = vld [vmem:[#allocation5 + $0x530] sm:$0xff]  ;;  %v778_v47 = vld [vmem:[#allocation5 + $0x118] sm:$0xff] }
 0x189   : > { %1235 = vmatpush1.msra.mxu1 %v933_v18  ;;  %1165 = vmatprep.subr.mxu0 %v802_v19  ;;  %v906_v48 = vld [vmem:[#allocation5 + $0x518] sm:$0xff]  ;;  %v777_v49 = vld [vmem:[#allocation5 + $0x110] sm:$0xff] }
 0x18a   : > { %1236 = vmatprep.subr.mxu1 %v930_v20  ;;  %1166 = vmatpush1.msra.mxu0 %v801_v22  ;;  %v905_v50 = vld [vmem:[#allocation5 + $0x510] sm:$0xff]  ;;  %v774_v51 = vld [vmem:[#allocation5 + $0xf8] sm:$0xff] }
 0x18b   : > { %1237 = vmatpush1.msra.mxu1 %v929_v23  ;;  %1167 = vmatprep.subr.mxu0 %v798_v24  ;;  %v902_v52 = vld [vmem:[#allocation5 + $0x4f8] sm:$0xff]  ;;  %v773_v53 = vld [vmem:[#allocation5 + $0xf0] sm:$0xff] }
 0x18c   : > { %1238 = vmatprep.subr.mxu1 %v926_v26  ;;  %1168 = vmatpush1.msra.mxu0 %v797_v27  ;;  %v901_v54 = vld [vmem:[#allocation5 + $0x4f0] sm:$0xff]  ;;  %v770_v55 = vld [vmem:[#allocation5 + $0xd8] sm:$0xff] }
 0x18d   : > { %1239 = vmatpush1.msra.mxu1 %v925_v29  ;;  %1169 = vmatprep.subr.mxu0 %v794_v30  ;;  %v898_v56 = vld [vmem:[#allocation5 + $0x4d8] sm:$0xff]  ;;  %v769_v57 = vld [vmem:[#allocation5 + $0xd0] sm:$0xff] }
 0x18e   : > { %1240 = vmatprep.subr.mxu1 %v922_v32  ;;  %1170 = vmatpush1.msra.mxu0 %v793_v33  ;;  %v897_v58 = vld [vmem:[#allocation5 + $0x4d0] sm:$0xff]  ;;  %v766_v59 = vld [vmem:[#allocation5 + $0xb8] sm:$0xff] }
 0x18f   : > { %1241 = vmatpush1.msra.mxu1 %v921_v34  ;;  %1171 = vmatprep.subr.mxu0 %v790_v35  ;;  %v894_v60 = vld [vmem:[#allocation5 + $0x4b8] sm:$0xff]  ;;  %v765_v61 = vld [vmem:[#allocation5 + $0xb0] sm:$0xff] }
 0x190   : > { %1242 = vmatprep.subr.mxu1 %v918_v36  ;;  %1172 = vmatpush1.msra.mxu0 %v789_v37  ;;  %v893_v62 = vld [vmem:[#allocation5 + $0x4b0] sm:$0xff]  ;;  %v762_v63 = vld [vmem:[#allocation5 + $0x98] sm:$0xff] }
 0x191   : > { %1243 = vmatpush1.msra.mxu1 %v917_v38  ;;  %1173 = vmatprep.subr.mxu0 %v786_v39  ;;  %v890_v0 = vld [vmem:[#allocation5 + $0x498] sm:$0xff]  ;;  %v761_v1 = vld [vmem:[#allocation5 + $0x90] sm:$0xff] }
 0x192   : > { %1244 = vmatprep.subr.mxu1 %v914_v40  ;;  %1174 = vmatpush1.msra.mxu0 %v785_v41  ;;  %v889_v2 = vld [vmem:[#allocation5 + $0x490] sm:$0xff]  ;;  %v758_v3 = vld [vmem:[#allocation5 + $0x78] sm:$0xff] }
 0x193   : > { %1245 = vmatpush1.msra.mxu1 %v913_v42  ;;  %1175 = vmatprep.subr.mxu0 %v782_v43  ;;  %v886_v4 = vld [vmem:[#allocation5 + $0x478] sm:$0xff]  ;;  %v757_v5 = vld [vmem:[#allocation5 + $0x70] sm:$0xff] }
 0x194   : > { %1246 = vmatprep.subr.mxu1 %v910_v44  ;;  %1176 = vmatpush1.msra.mxu0 %v781_v45  ;;  %v885_v6 = vld [vmem:[#allocation5 + $0x470] sm:$0xff]  ;;  %v754_v7 = vld [vmem:[#allocation5 + $0x58] sm:$0xff] }
 0x195   : > { %1247 = vmatpush1.msra.mxu1 %v909_v46  ;;  %1177 = vmatprep.subr.mxu0 %v778_v47  ;;  %v882_v8 = vld [vmem:[#allocation5 + $0x458] sm:$0xff]  ;;  %v753_v10 = vld [vmem:[#allocation5 + $0x50] sm:$0xff] }
 0x196   : > { %1248 = vmatprep.subr.mxu1 %v906_v48  ;;  %1178 = vmatpush1.msra.mxu0 %v777_v49  ;;  %v881_v14 = vld [vmem:[#allocation5 + $0x450] sm:$0xff]  ;;  %v750_v15 = vld [vmem:[#allocation5 + $0x38] sm:$0xff] }
 0x197   : > { %1249 = vmatpush1.msra.mxu1 %v905_v50  ;;  %1179 = vmatprep.subr.mxu0 %v774_v51  ;;  %v878_v17 = vld [vmem:[#allocation5 + $0x438] sm:$0xff]  ;;  %v749_v18 = vld [vmem:[#allocation5 + $0x30] sm:$0xff] }
 0x198   : > { %1250 = vmatprep.subr.mxu1 %v902_v52  ;;  %1180 = vmatpush1.msra.mxu0 %v773_v53  ;;  %v877_v19 = vld [vmem:[#allocation5 + $0x430] sm:$0xff]  ;;  %v746_v20 = vld [vmem:[#allocation5 + $0x18] sm:$0xff] }
 0x199   : > { %1251 = vmatpush1.msra.mxu1 %v901_v54  ;;  %1181 = vmatprep.subr.mxu0 %v770_v55  ;;  %v874_v22 = vld [vmem:[#allocation5 + $0x418] sm:$0xff]  ;;  %v745_v23 = vld [vmem:[#allocation5 + $0x10] sm:$0xff] }
 0x19a   : > { %1252 = vmatprep.subr.mxu1 %v898_v56  ;;  %1182 = vmatpush1.msra.mxu0 %v769_v57  ;;  %v873_v24 = vld [vmem:[#allocation5 + $0x410] sm:$0xff]  ;;  %v870_v26 = vld [vmem:[#allocation5 + $0x3f8] sm:$0xff] }
 0x19b   : > { %1253 = vmatpush1.msra.mxu1 %v897_v58  ;;  %1183 = vmatprep.subr.mxu0 %v766_v59  ;;  %v998_v27 = vld [vmem:[#allocation5 + $0x7f8] sm:$0xff]  ;;  %v869_v29 = vld [vmem:[#allocation5 + $0x3f0] sm:$0xff] }
 0x19c   : > { %1254 = vmatprep.subr.mxu1 %v894_v60  ;;  %1184 = vmatpush1.msra.mxu0 %v765_v61  ;;  %v997_v30 = vld [vmem:[#allocation5 + $0x7f0] sm:$0xff]  ;;  %v866_v32 = vld [vmem:[#allocation5 + $0x3d8] sm:$0xff] }
 0x19d   : > { %1255 = vmatpush1.msra.mxu1 %v893_v62  ;;  %1185 = vmatprep.subr.mxu0 %v762_v63  ;;  %v994_v33 = vld [vmem:[#allocation5 + $0x7d8] sm:$0xff]  ;;  %v865_v34 = vld [vmem:[#allocation5 + $0x3d0] sm:$0xff] }
 0x19e   : > { %1256 = vmatprep.subr.mxu1 %v890_v0  ;;  %1186 = vmatpush1.msra.mxu0 %v761_v1  ;;  %v993_v35 = vld [vmem:[#allocation5 + $0x7d0] sm:$0xff]  ;;  %v862_v36 = vld [vmem:[#allocation5 + $0x3b8] sm:$0xff] }
 0x19f   : > { %1257 = vmatpush1.msra.mxu1 %v889_v2  ;;  %1187 = vmatprep.subr.mxu0 %v758_v3  ;;  %v990_v37 = vld [vmem:[#allocation5 + $0x7b8] sm:$0xff]  ;;  %v861_v38 = vld [vmem:[#allocation5 + $0x3b0] sm:$0xff] }
 0x1a0   : > { %1258 = vmatprep.subr.mxu1 %v886_v4  ;;  %1188 = vmatpush1.msra.mxu0 %v757_v5  ;;  %v989_v39 = vld [vmem:[#allocation5 + $0x7b0] sm:$0xff]  ;;  %v858_v40 = vld [vmem:[#allocation5 + $0x398] sm:$0xff] }
 0x1a1   : > { %1259 = vmatpush1.msra.mxu1 %v885_v6  ;;  %1189 = vmatprep.subr.mxu0 %v754_v7  ;;  %v986_v41 = vld [vmem:[#allocation5 + $0x798] sm:$0xff]  ;;  %v857_v42 = vld [vmem:[#allocation5 + $0x390] sm:$0xff] }
 0x1a2   : > { %1260 = vmatprep.subr.mxu1 %v882_v8  ;;  %1190 = vmatpush1.msra.mxu0 %v753_v10  ;;  %v985_v43 = vld [vmem:[#allocation5 + $0x790] sm:$0xff]  ;;  %v854_v44 = vld [vmem:[#allocation5 + $0x378] sm:$0xff] }
 0x1a3   : > { %1261 = vmatpush1.msra.mxu1 %v881_v14  ;;  %1191 = vmatprep.subr.mxu0 %v750_v15  ;;  %v982_v45 = vld [vmem:[#allocation5 + $0x778] sm:$0xff]  ;;  %v853_v46 = vld [vmem:[#allocation5 + $0x370] sm:$0xff] }
 0x1a4   : > { %1262 = vmatprep.subr.mxu1 %v878_v17  ;;  %1192 = vmatpush1.msra.mxu0 %v749_v18  ;;  %v981_v47 = vld [vmem:[#allocation5 + $0x770] sm:$0xff]  ;;  %v850_v48 = vld [vmem:[#allocation5 + $0x358] sm:$0xff] }
 0x1a5   : > { %1263 = vmatpush1.msra.mxu1 %v877_v19  ;;  %1193 = vmatprep.subr.mxu0 %v746_v20  ;;  %v978_v49 = vld [vmem:[#allocation5 + $0x758] sm:$0xff]  ;;  %v849_v50 = vld [vmem:[#allocation5 + $0x350] sm:$0xff] }
 0x1a6   : > { %1264 = vmatprep.subr.mxu1 %v874_v22  ;;  %1194 = vmatpush1.msra.mxu0 %v745_v23  ;;  %v977_v51 = vld [vmem:[#allocation5 + $0x750] sm:$0xff]  ;;  %v846_v52 = vld [vmem:[#allocation5 + $0x338] sm:$0xff] }
 0x1a7   : > { %1265 = vmatpush1.msra.mxu1 %v873_v24  ;;  %1195 = vmatprep.subr.mxu0 %v870_v26  ;;  %v974_v53 = vld [vmem:[#allocation5 + $0x738] sm:$0xff]  ;;  %v845_v54 = vld [vmem:[#allocation5 + $0x330] sm:$0xff] }
 0x1a8   : > { %1266 = vmatprep.subr.mxu1 %v998_v27  ;;  %1196 = vmatpush2.msra.mxu0 %v869_v29  ;;  %v973_v55 = vld [vmem:[#allocation5 + $0x730] sm:$0xff]  ;;  %v842_v56 = vld [vmem:[#allocation5 + $0x318] sm:$0xff] }
 0x1a9   : > { %1267 = vmatpush2.msra.mxu1 %v997_v30  ;;  %1197 = vmatprep.subr.mxu0 %v866_v32  ;;  %v970_v57 = vld [vmem:[#allocation5 + $0x718] sm:$0xff]  ;;  %v841_v58 = vld [vmem:[#allocation5 + $0x310] sm:$0xff] }
 0x1aa   : > { %1268 = vmatprep.subr.mxu1 %v994_v33  ;;  %1198 = vmatpush2.msra.mxu0 %v865_v34  ;;  %v969_v59 = vld [vmem:[#allocation5 + $0x710] sm:$0xff]  ;;  %v838_v60 = vld [vmem:[#allocation5 + $0x2f8] sm:$0xff] }
 0x1ab   : > { %1269 = vmatpush2.msra.mxu1 %v993_v35  ;;  %1199 = vmatprep.subr.mxu0 %v862_v36  ;;  %v966_v61 = vld [vmem:[#allocation5 + $0x6f8] sm:$0xff]  ;;  %v837_v62 = vld [vmem:[#allocation5 + $0x2f0] sm:$0xff] }
 0x1ac   : > { %1270 = vmatprep.subr.mxu1 %v990_v37  ;;  %1200 = vmatpush2.msra.mxu0 %v861_v38  ;;  %v965_v63 = vld [vmem:[#allocation5 + $0x6f0] sm:$0xff]  ;;  %v834_v0 = vld [vmem:[#allocation5 + $0x2d8] sm:$0xff] }
 0x1ad   : > { %1271 = vmatpush2.msra.mxu1 %v989_v39  ;;  %1201 = vmatprep.subr.mxu0 %v858_v40  ;;  %v962_v1 = vld [vmem:[#allocation5 + $0x6d8] sm:$0xff]  ;;  %v833_v2 = vld [vmem:[#allocation5 + $0x2d0] sm:$0xff]  ;;  %v1487_v39 = vld [vmem:[#allocation7 + $0xe8] sm:$0xff] }
 0x1ae   : > { %1272 = vmatprep.subr.mxu1 %v986_v41  ;;  %1202 = vmatpush2.msra.mxu0 %v857_v42  ;;  %v961_v3 = vld [vmem:[#allocation5 + $0x6d0] sm:$0xff]  ;;  %v830_v4 = vld [vmem:[#allocation5 + $0x2b8] sm:$0xff]  ;;  %v1486_v40 = vld [vmem:[#allocation7 + $0xe0] sm:$0xff] }
 0x1af   : > { %1273 = vmatpush2.msra.mxu1 %v985_v43  ;;  %1203 = vmatprep.subr.mxu0 %v854_v44  ;;  %v958_v5 = vld [vmem:[#allocation5 + $0x6b8] sm:$0xff]  ;;  %v829_v6 = vld [vmem:[#allocation5 + $0x2b0] sm:$0xff]  ;;  %v1482_v43 = vld [vmem:[#allocation7 + $0xc0] sm:$0xff] }
 0x1b0   : > { %1274 = vmatprep.subr.mxu1 %v982_v45  ;;  %1204 = vmatpush2.msra.mxu0 %v853_v46  ;;  %v957_v7 = vld [vmem:[#allocation5 + $0x6b0] sm:$0xff]  ;;  %v826_v8 = vld [vmem:[#allocation5 + $0x298] sm:$0xff]  ;;  %v1478_v44 = vld [vmem:[#allocation7 + $0xa0] sm:$0xff] }
 0x1b1   : > { %1275 = vmatpush2.msra.mxu1 %v981_v47  ;;  %1205 = vmatprep.subr.mxu0 %v850_v48  ;;  %v954_v10 = vld [vmem:[#allocation5 + $0x698] sm:$0xff]  ;;  %v825_v14 = vld [vmem:[#allocation5 + $0x290] sm:$0xff]  ;;  %v1475_v47 = vld [vmem:[#allocation7 + $0x88] sm:$0xff] }
 0x1b2   : > { %1276 = vmatprep.subr.mxu1 %v978_v49  ;;  %1206 = vmatpush2.msra.mxu0 %v849_v50  ;;  %v953_v15 = vld [vmem:[#allocation5 + $0x690] sm:$0xff]  ;;  %v822_v17 = vld [vmem:[#allocation5 + $0x278] sm:$0xff]  ;;  %v1474_v48 = vld [vmem:[#allocation7 + $0x80] sm:$0xff] }
 0x1b3   : > { %1277 = vmatpush2.msra.mxu1 %v977_v51  ;;  %1207 = vmatprep.subr.mxu0 %v846_v52  ;;  %v950_v18 = vld [vmem:[#allocation5 + $0x678] sm:$0xff]  ;;  %v821_v19 = vld [vmem:[#allocation5 + $0x270] sm:$0xff]  ;;  %v1471_v51 = vld [vmem:[#allocation7 + $0x68] sm:$0xff] }
 0x1b4   : > { %1278 = vmatprep.subr.mxu1 %v974_v53  ;;  %1208 = vmatpush2.msra.mxu0 %v845_v54  ;;  %v949_v20 = vld [vmem:[#allocation5 + $0x670] sm:$0xff]  ;;  %v818_v22 = vld [vmem:[#allocation5 + $0x258] sm:$0xff]  ;;  %v1470_v52 = vld [vmem:[#allocation7 + $0x60] sm:$0xff] }
 0x1b5   : > { %1279 = vmatpush2.msra.mxu1 %v973_v55  ;;  %1209 = vmatprep.subr.mxu0 %v842_v56  ;;  %v946_v23 = vld [vmem:[#allocation5 + $0x658] sm:$0xff]  ;;  %v817_v24 = vld [vmem:[#allocation5 + $0x250] sm:$0xff]  ;;  %v1467_v55 = vld [vmem:[#allocation7 + $0x48] sm:$0xff] }
 0x1b6   : > { %1280 = vmatprep.subr.mxu1 %v970_v57  ;;  %1210 = vmatpush2.msra.mxu0 %v841_v58  ;;  %v945_v26 = vld [vmem:[#allocation5 + $0x650] sm:$0xff]  ;;  %v814_v27 = vld [vmem:[#allocation5 + $0x238] sm:$0xff]  ;;  %v1466_v56 = vld [vmem:[#allocation7 + $0x40] sm:$0xff] }
 0x1b7   : > { %1281 = vmatpush2.msra.mxu1 %v969_v59  ;;  %1211 = vmatprep.subr.mxu0 %v838_v60  ;;  %v942_v29 = vld [vmem:[#allocation5 + $0x638] sm:$0xff]  ;;  %v813_v30 = vld [vmem:[#allocation5 + $0x230] sm:$0xff]  ;;  %v1463_v59 = vld [vmem:[#allocation7 + $0x28] sm:$0xff] }
 0x1b8   : > { %1282 = vmatprep.subr.mxu1 %v966_v61  ;;  %1212 = vmatpush2.msra.mxu0 %v837_v62  ;;  %v941_v32 = vld [vmem:[#allocation5 + $0x630] sm:$0xff]  ;;  %v810_v33 = vld [vmem:[#allocation5 + $0x218] sm:$0xff]  ;;  %v1462_v60 = vld [vmem:[#allocation7 + $0x20] sm:$0xff] }
 0x1b9   : > { %1283 = vmatpush2.msra.mxu1 %v965_v63  ;;  %1213 = vmatprep.subr.mxu0 %v834_v0  ;;  %v938_v34 = vld [vmem:[#allocation5 + $0x618] sm:$0xff]  ;;  %v809_v35 = vld [vmem:[#allocation5 + $0x210] sm:$0xff]  ;;  %v1459_v63 = vld [vmem:[#allocation7 + $0x8] sm:$0xff] }
 0x1ba   : > { %1284 = vmatprep.subr.mxu1 %v962_v1  ;;  %1214 = vmatpush2.msra.mxu0 %v833_v2  ;;  %v937_v36 = vld [vmem:[#allocation5 + $0x610] sm:$0xff]  ;;  %v1489_v37 = vld [vmem:[#allocation7 + $0xf8] sm:$0xff]  ;;  %v1458_v0 = vld [vmem:[#allocation7] sm:$0xff] }
 0x1bb   : > { %1285 = vmatpush2.msra.mxu1 %v961_v3  ;;  %1215 = vmatprep.subr.mxu0 %v830_v4  ;;  %v1488_v38 = vld [vmem:[#allocation7 + $0xf0] sm:$0xff]  ;;  %v1485_v41 = vld [vmem:[#allocation7 + $0xd8] sm:$0xff]  ;;  %v1519_v3 = vld [vmem:[#allocation7 + $0x1e8] sm:$0xff] }
 0x1bc   : > { %1286 = vmatprep.subr.mxu1 %v958_v5  ;;  %1216 = vmatpush2.msra.mxu0 %v829_v6  ;;  %v1484_v42 = vld [vmem:[#allocation7 + $0xd0] sm:$0xff]  ;;  %v1477_v45 = vld [vmem:[#allocation7 + $0x98] sm:$0xff]  ;;  %v1518_v4 = vld [vmem:[#allocation7 + $0x1e0] sm:$0xff] }
 0x1bd   : > { %1287 = vmatpush2.msra.mxu1 %v957_v7  ;;  %1217 = vmatprep.subr.mxu0 %v826_v8  ;;  %v1476_v46 = vld [vmem:[#allocation7 + $0x90] sm:$0xff]  ;;  %v1473_v49 = vld [vmem:[#allocation7 + $0x78] sm:$0xff]  ;;  %v1515_v7 = vld [vmem:[#allocation7 + $0x1c8] sm:$0xff] }
 0x1be   : > { %1288 = vmatprep.subr.mxu1 %v954_v10  ;;  %1218 = vmatpush2.msra.mxu0 %v825_v14  ;;  %v1472_v50 = vld [vmem:[#allocation7 + $0x70] sm:$0xff]  ;;  %v1469_v53 = vld [vmem:[#allocation7 + $0x58] sm:$0xff]  ;;  %v1514_v8 = vld [vmem:[#allocation7 + $0x1c0] sm:$0xff] }
 0x1bf   : > { %1289 = vmatpush2.msra.mxu1 %v953_v15  ;;  %1219 = vmatprep.subr.mxu0 %v822_v17  ;;  %v1468_v54 = vld [vmem:[#allocation7 + $0x50] sm:$0xff]  ;;  %v1465_v57 = vld [vmem:[#allocation7 + $0x38] sm:$0xff]  ;;  %v1511_v15 = vld [vmem:[#allocation7 + $0x1a8] sm:$0xff] }
 0x1c0   : > { %1290 = vmatprep.subr.mxu1 %v950_v18  ;;  %1220 = vmatpush2.msra.mxu0 %v821_v19  ;;  %v1464_v58 = vld [vmem:[#allocation7 + $0x30] sm:$0xff]  ;;  %v1461_v61 = vld [vmem:[#allocation7 + $0x18] sm:$0xff]  ;;  %v1510_v17 = vld [vmem:[#allocation7 + $0x1a0] sm:$0xff] }
 0x1c1   : > { %1291 = vmatpush2.msra.mxu1 %v949_v20  ;;  %1221 = vmatprep.subr.mxu0 %v818_v22  ;;  %v1460_v62 = vld [vmem:[#allocation7 + $0x10] sm:$0xff]  ;;  %v1521_v1 = vld [vmem:[#allocation7 + $0x1f8] sm:$0xff]  ;;  %v1507_v20 = vld [vmem:[#allocation7 + $0x188] sm:$0xff] }
 0x1c2   : > { %1292 = vmatprep.subr.mxu1 %v946_v23  ;;  %1222 = vmatpush2.msra.mxu0 %v817_v24  ;;  %v1520_v2 = vld [vmem:[#allocation7 + $0x1f0] sm:$0xff]  ;;  %v1517_v5 = vld [vmem:[#allocation7 + $0x1d8] sm:$0xff]  ;;  %v1506_v22 = vld [vmem:[#allocation7 + $0x180] sm:$0xff] }
 0x1c3   : > { %1293 = vmatpush2.msra.mxu1 %v945_v26  ;;  %1223 = vmatprep.subr.mxu0 %v814_v27  ;;  %v1516_v6 = vld [vmem:[#allocation7 + $0x1d0] sm:$0xff]  ;;  %v1513_v10 = vld [vmem:[#allocation7 + $0x1b8] sm:$0xff]  ;;  %v1503_v26 = vld [vmem:[#allocation7 + $0x168] sm:$0xff] }
 0x1c4   : > { %1294 = vmatprep.subr.mxu1 %v942_v29  ;;  %1224 = vmatpush2.msra.mxu0 %v813_v30  ;;  %v1512_v14 = vld [vmem:[#allocation7 + $0x1b0] sm:$0xff]  ;;  %v1509_v18 = vld [vmem:[#allocation7 + $0x198] sm:$0xff]  ;;  %v1502_v27 = vld [vmem:[#allocation7 + $0x160] sm:$0xff] }
 0x1c5   : > { %1295 = vmatpush2.msra.mxu1 %v941_v32  ;;  %1225 = vmatprep.subr.mxu0 %v810_v33  ;;  %v1508_v19 = vld [vmem:[#allocation7 + $0x190] sm:$0xff]  ;;  %v1505_v23 = vld [vmem:[#allocation7 + $0x178] sm:$0xff]  ;;  %v1499_v32 = vld [vmem:[#allocation7 + $0x148] sm:$0xff] }
 0x1c6   : > { %1296 = vmatprep.subr.mxu1 %v938_v34  ;;  %1226 = vmatpush2.msra.mxu0 %v809_v35  ;;  %v1504_v24 = vld [vmem:[#allocation7 + $0x170] sm:$0xff]  ;;  %v1501_v29 = vld [vmem:[#allocation7 + $0x158] sm:$0xff]  ;;  %v1498_v33 = vld [vmem:[#allocation7 + $0x140] sm:$0xff] }
 0x1c7   : > { %1227 = vmatprep.mubr.f32.mxu0 %v2360_v9  ;;  %1297 = vmatpush2.msra.mxu1 %v937_v36  ;;  %v1483_v9 = vld [vmem:[#allocation7 + $0xc8] sm:$0xff]  ;;  %v1500_v30 = vld [vmem:[#allocation7 + $0x150] sm:$0xff]  ;;  %v1497_v34 = vld [vmem:[#allocation7 + $0x138] sm:$0xff] }
 0x1c8   : > { %1298 = vmatprep.mubr.f32.mxu1 %v2365_v13  ;;  %1228 = vmatmul.mubr.f32.vlgmr.msra.gmra.mxu0 %v2363_v11  ;;  %v1481_v13 = vld [vmem:[#allocation7 + $0xb8] sm:$0xff]  ;;  %v1480_v11 = vld [vmem:[#allocation7 + $0xb0] sm:$0xff]  ;;  %v1495_v36 = vld [vmem:[#allocation7 + $0x128] sm:$0xff] }
 0x1c9   : > { %1299 = vmatmul.mubr.f32.vlgmr.msra.gmra.mxu1 %v2368_v16  ;;  %1598 = vmatprep.subr.mxu0 %v1489_v37  ;;  %v1479_v16 = vld [vmem:[#allocation7 + $0xa8] sm:$0xff]  ;;  %v1496_v35 = vld [vmem:[#allocation7 + $0x130] sm:$0xff]  ;;  %v1494_v37 = vld [vmem:[#allocation7 + $0x120] sm:$0xff] }
 0x1ca   : > { %1599 = vmatpush1.msra.mxu0 %v1488_v38  ;;  %v1493_v38 = vld [vmem:[#allocation7 + $0x118] sm:$0xff] }
 0x1cb   : > { %1600 = vmatprep.subr.mxu0 %v1487_v39  ;;  %v1492_v39 = vld [vmem:[#allocation7 + $0x110] sm:$0xff] }
 0x1cc   : > { %1601 = vmatpush1.msra.mxu0 %v1486_v40  ;;  %v1491_v40 = vld [vmem:[#allocation7 + $0x108] sm:$0xff] }
 0x1cd   : > { %1602 = vmatprep.subr.mxu0 %v1485_v41  ;;  %v1490_v41 = vld [vmem:[#allocation7 + $0x100] sm:$0xff] }
 0x1ce   : > { %1603 = vmatpush1.msra.mxu0 %v1484_v42  ;;  %v1553_v42 = vld [vmem:[#allocation7 + $0x2f8] sm:$0xff] }
 0x1cf   : > { %1604 = vmatprep.subr.mxu0 %v1483_v9  ;;  %1669 = vmatprep.subr.mxu1 %v1553_v42  ;;  %v1552_v9 = vld [vmem:[#allocation7 + $0x2f0] sm:$0xff]  ;;  %v1561_v42 = vld [vmem:[#allocation7 + $0x338] sm:$0xff] }
 0x1d0   : > { %1605 = vmatpush1.msra.mxu0 %v1482_v43  ;;  %1670 = vmatpush1.msra.mxu1 %v1552_v9  ;;  %v1551_v43 = vld [vmem:[#allocation7 + $0x2e8] sm:$0xff] }
 0x1d1   : > { %1606 = vmatprep.subr.mxu0 %v1481_v13  ;;  %1671 = vmatprep.subr.mxu1 %v1551_v43  ;;  %v1550_v13 = vld [vmem:[#allocation7 + $0x2e0] sm:$0xff]  ;;  %v1560_v43 = vld [vmem:[#allocation7 + $0x330] sm:$0xff] }
 0x1d2   : > { %1607 = vmatpush1.msra.mxu0 %v1480_v11  ;;  %1672 = vmatpush1.msra.mxu1 %v1550_v13  ;;  %v1549_v11 = vld [vmem:[#allocation7 + $0x2d8] sm:$0xff]  ;;  %v1559_v13 = vld [vmem:[#allocation7 + $0x328] sm:$0xff] }
 0x1d3   : > { %1608 = vmatprep.subr.mxu0 %v1479_v16  ;;  %1673 = vmatprep.subr.mxu1 %v1549_v11  ;;  %v1548_v16 = vld [vmem:[#allocation7 + $0x2d0] sm:$0xff]  ;;  %v1558_v11 = vld [vmem:[#allocation7 + $0x320] sm:$0xff] }
 0x1d4   : > { %1609 = vmatpush1.msra.mxu0 %v1478_v44  ;;  %1674 = vmatpush1.msra.mxu1 %v1548_v16  ;;  %v1547_v44 = vld [vmem:[#allocation7 + $0x2c8] sm:$0xff] }
 0x1d5   : > { %1610 = vmatprep.subr.mxu0 %v1477_v45  ;;  %1675 = vmatprep.subr.mxu1 %v1547_v44  ;;  %v1546_v45 = vld [vmem:[#allocation7 + $0x2c0] sm:$0xff]  ;;  %v1557_v44 = vld [vmem:[#allocation7 + $0x318] sm:$0xff] }
 0x1d6   : > { %1611 = vmatpush1.msra.mxu0 %v1476_v46  ;;  %1676 = vmatpush1.msra.mxu1 %v1546_v45  ;;  %v1545_v46 = vld [vmem:[#allocation7 + $0x2b8] sm:$0xff] }
 0x1d7   : > { %1612 = vmatprep.subr.mxu0 %v1475_v47  ;;  %1677 = vmatprep.subr.mxu1 %v1545_v46  ;;  %v1544_v47 = vld [vmem:[#allocation7 + $0x2b0] sm:$0xff]  ;;  %v2115_v46 = vmov 0.0  }
 0x1d8   : > { %1613 = vmatpush1.msra.mxu0 %v1474_v48  ;;  %1678 = vmatpush1.msra.mxu1 %v1544_v47  ;;  %v1543_v48 = vld [vmem:[#allocation7 + $0x2a8] sm:$0xff]  ;;  %v2387_v47 = vsel %vm1307_vm4, 1.0, %v2115_v46 }
 0x1d9   : > { %1614 = vmatprep.subr.mxu0 %v1473_v49  ;;  %1679 = vmatprep.subr.mxu1 %v1543_v48  ;;  %v1542_v49 = vld [vmem:[#allocation7 + $0x2a0] sm:$0xff] }
 0x1da   : > { %1615 = vmatpush1.msra.mxu0 %v1472_v50  ;;  %1680 = vmatpush1.msra.mxu1 %v1542_v49  ;;  %v1541_v50 = vld [vmem:[#allocation7 + $0x298] sm:$0xff] }
 0x1db   : > { %1616 = vmatprep.subr.mxu0 %v1471_v51  ;;  %1681 = vmatprep.subr.mxu1 %v1541_v50  ;;  %v1540_v51 = vld [vmem:[#allocation7 + $0x290] sm:$0xff] }
 0x1dc   : > { %1617 = vmatpush1.msra.mxu0 %v1470_v52  ;;  %1682 = vmatpush1.msra.mxu1 %v1540_v51  ;;  %v1539_v52 = vld [vmem:[#allocation7 + $0x288] sm:$0xff] }
 0x1dd   : > { %1618 = vmatprep.subr.mxu0 %v1469_v53  ;;  %1683 = vmatprep.subr.mxu1 %v1539_v52  ;;  %v1538_v53 = vld [vmem:[#allocation7 + $0x280] sm:$0xff]  ;;  %v1555_v51 = vld [vmem:[#allocation7 + $0x308] sm:$0xff] }
 0x1de   : > { %1619 = vmatpush1.msra.mxu0 %v1468_v54  ;;  %1684 = vmatpush1.msra.mxu1 %v1538_v53  ;;  %v1537_v54 = vld [vmem:[#allocation7 + $0x278] sm:$0xff]  ;;  %v1554_v53 = vld [vmem:[#allocation7 + $0x300] sm:$0xff] }
 0x1df   : > { %1620 = vmatprep.subr.mxu0 %v1467_v55  ;;  %1685 = vmatprep.subr.mxu1 %v1537_v54  ;;  %v1536_v55 = vld [vmem:[#allocation7 + $0x270] sm:$0xff] }
 0x1e0   : > { %1621 = vmatpush1.msra.mxu0 %v1466_v56  ;;  %1686 = vmatpush1.msra.mxu1 %v1536_v55  ;;  %v1535_v56 = vld [vmem:[#allocation7 + $0x268] sm:$0xff] }
 0x1e1   : > { %1622 = vmatprep.subr.mxu0 %v1465_v57  ;;  %1687 = vmatprep.subr.mxu1 %v1535_v56  ;;  %v1534_v57 = vld [vmem:[#allocation7 + $0x260] sm:$0xff] }
 0x1e2   : > { %1623 = vmatpush1.msra.mxu0 %v1464_v58  ;;  %1688 = vmatpush1.msra.mxu1 %v1534_v57  ;;  %v1533_v58 = vld [vmem:[#allocation7 + $0x258] sm:$0xff] }
 0x1e3   : > { %1624 = vmatprep.subr.mxu0 %v1463_v59  ;;  %1689 = vmatprep.subr.mxu1 %v1533_v58  ;;  %v1532_v59 = vld [vmem:[#allocation7 + $0x250] sm:$0xff] }
 0x1e4   : > { %1625 = vmatpush1.msra.mxu0 %v1462_v60  ;;  %1690 = vmatpush1.msra.mxu1 %v1532_v59  ;;  %v1531_v60 = vld [vmem:[#allocation7 + $0x248] sm:$0xff] }
 0x1e5   : > { %1626 = vmatprep.subr.mxu0 %v1461_v61  ;;  %1691 = vmatprep.subr.mxu1 %v1531_v60  ;;  %v1530_v61 = vld [vmem:[#allocation7 + $0x240] sm:$0xff] }
 0x1e6   : > { %1627 = vmatpush1.msra.mxu0 %v1460_v62  ;;  %1692 = vmatpush1.msra.mxu1 %v1530_v61  ;;  %v1529_v62 = vld [vmem:[#allocation7 + $0x238] sm:$0xff] }
 0x1e7   : > { %1628 = vmatprep.subr.mxu0 %v1459_v63  ;;  %1693 = vmatprep.subr.mxu1 %v1529_v62  ;;  %v1528_v63 = vld [vmem:[#allocation7 + $0x230] sm:$0xff] }
 0x1e8   : > { %1629 = vmatpush1.msra.mxu0 %v1458_v0  ;;  %1694 = vmatpush1.msra.mxu1 %v1528_v63  ;;  %v1527_v0 = vld [vmem:[#allocation7 + $0x228] sm:$0xff] }
 0x1e9   : > { %1630 = vmatprep.subr.mxu0 %v1521_v1  ;;  %1695 = vmatprep.subr.mxu1 %v1527_v0  ;;  %v1526_v1 = vld [vmem:[#allocation7 + $0x220] sm:$0xff] }
 0x1ea   : > { %1631 = vmatpush2.msra.mxu0 %v1520_v2  ;;  %1696 = vmatpush1.msra.mxu1 %v1526_v1  ;;  %v1525_v2 = vld [vmem:[#allocation7 + $0x218] sm:$0xff] }
 0x1eb   : > { %1632 = vmatprep.subr.mxu0 %v1519_v3  ;;  %1697 = vmatprep.subr.mxu1 %v1525_v2  ;;  %v1524_v3 = vld [vmem:[#allocation7 + $0x210] sm:$0xff] }
 0x1ec   : > { %1633 = vmatpush2.msra.mxu0 %v1518_v4  ;;  %1698 = vmatpush1.msra.mxu1 %v1524_v3  ;;  %v1523_v4 = vld [vmem:[#allocation7 + $0x208] sm:$0xff] }
 0x1ed   : > { %1634 = vmatprep.subr.mxu0 %v1517_v5  ;;  %1699 = vmatprep.subr.mxu1 %v1523_v4  ;;  %v1522_v5 = vld [vmem:[#allocation7 + $0x200] sm:$0xff] }
 0x1ee   : > { %1635 = vmatpush2.msra.mxu0 %v1516_v6  ;;  %1700 = vmatpush1.msra.mxu1 %v1522_v5  ;;  %v1585_v6 = vld [vmem:[#allocation7 + $0x3f8] sm:$0xff] }
 0x1ef   : > { %1636 = vmatprep.subr.mxu0 %v1515_v7  ;;  %1701 = vmatprep.subr.mxu1 %v1585_v6  ;;  %v1584_v7 = vld [vmem:[#allocation7 + $0x3f0] sm:$0xff] }
 0x1f0   : > { %1637 = vmatpush2.msra.mxu0 %v1514_v8  ;;  %1702 = vmatpush2.msra.mxu1 %v1584_v7  ;;  %v1583_v8 = vld [vmem:[#allocation7 + $0x3e8] sm:$0xff] }
 0x1f1   : > { %1638 = vmatprep.subr.mxu0 %v1513_v10  ;;  %1703 = vmatprep.subr.mxu1 %v1583_v8  ;;  %v1582_v10 = vld [vmem:[#allocation7 + $0x3e0] sm:$0xff] }
 0x1f2   : > { %1639 = vmatpush2.msra.mxu0 %v1512_v14  ;;  %1704 = vmatpush2.msra.mxu1 %v1582_v10  ;;  %v1581_v14 = vld [vmem:[#allocation7 + $0x3d8] sm:$0xff] }
 0x1f3   : > { %1640 = vmatprep.subr.mxu0 %v1511_v15  ;;  %1705 = vmatprep.subr.mxu1 %v1581_v14  ;;  %v1580_v15 = vld [vmem:[#allocation7 + $0x3d0] sm:$0xff] }
 0x1f4   : > { %1641 = vmatpush2.msra.mxu0 %v1510_v17  ;;  %1706 = vmatpush2.msra.mxu1 %v1580_v15  ;;  %v1579_v17 = vld [vmem:[#allocation7 + $0x3c8] sm:$0xff] }
 0x1f5   : > { %1642 = vmatprep.subr.mxu0 %v1509_v18  ;;  %1707 = vmatprep.subr.mxu1 %v1579_v17  ;;  %v1578_v18 = vld [vmem:[#allocation7 + $0x3c0] sm:$0xff] }
 0x1f6   : > { %1643 = vmatpush2.msra.mxu0 %v1508_v19  ;;  %1708 = vmatpush2.msra.mxu1 %v1578_v18  ;;  %v1577_v19 = vld [vmem:[#allocation7 + $0x3b8] sm:$0xff] }
 0x1f7   : > { %1644 = vmatprep.subr.mxu0 %v1507_v20  ;;  %1709 = vmatprep.subr.mxu1 %v1577_v19  ;;  %v1576_v20 = vld [vmem:[#allocation7 + $0x3b0] sm:$0xff] }
 0x1f8   : > { %1645 = vmatpush2.msra.mxu0 %v1506_v22  ;;  %1710 = vmatpush2.msra.mxu1 %v1576_v20  ;;  %v1575_v22 = vld [vmem:[#allocation7 + $0x3a8] sm:$0xff] }
 0x1f9   : > { %1646 = vmatprep.subr.mxu0 %v1505_v23  ;;  %1711 = vmatprep.subr.mxu1 %v1575_v22  ;;  %v1574_v23 = vld [vmem:[#allocation7 + $0x3a0] sm:$0xff] }
 0x1fa   : > { %1647 = vmatpush2.msra.mxu0 %v1504_v24  ;;  %1712 = vmatpush2.msra.mxu1 %v1574_v23  ;;  %v1573_v24 = vld [vmem:[#allocation7 + $0x398] sm:$0xff] }
 0x1fb   : > { %1648 = vmatprep.subr.mxu0 %v1503_v26  ;;  %1713 = vmatprep.subr.mxu1 %v1573_v24  ;;  %v1572_v26 = vld [vmem:[#allocation7 + $0x390] sm:$0xff] }
 0x1fc   : > { %1649 = vmatpush2.msra.mxu0 %v1502_v27  ;;  %1714 = vmatpush2.msra.mxu1 %v1572_v26  ;;  %v1571_v27 = vld [vmem:[#allocation7 + $0x388] sm:$0xff] }
 0x1fd   : > { %1650 = vmatprep.subr.mxu0 %v1501_v29  ;;  %1715 = vmatprep.subr.mxu1 %v1571_v27  ;;  %v1570_v29 = vld [vmem:[#allocation7 + $0x380] sm:$0xff] }
 0x1fe   : > { %1651 = vmatpush2.msra.mxu0 %v1500_v30  ;;  %1716 = vmatpush2.msra.mxu1 %v1570_v29  ;;  %v1569_v30 = vld [vmem:[#allocation7 + $0x378] sm:$0xff] }
 0x1ff   : > { %1652 = vmatprep.subr.mxu0 %v1499_v32  ;;  %1717 = vmatprep.subr.mxu1 %v1569_v30  ;;  %v1568_v32 = vld [vmem:[#allocation7 + $0x370] sm:$0xff] }
 0x200   : > { %1653 = vmatpush2.msra.mxu0 %v1498_v33  ;;  %1718 = vmatpush2.msra.mxu1 %v1568_v32  ;;  %v1567_v33 = vld [vmem:[#allocation7 + $0x368] sm:$0xff] }
 0x201   : > { %1654 = vmatprep.subr.mxu0 %v1497_v34  ;;  %v2380_v34 = vld [vmem:[%s2455_s4] sm:$0xf]  ;;  %1719 = vmatprep.subr.mxu1 %v1567_v33 }
 0x202   : > { %1655 = vmatpush2.msra.mxu0 %v1496_v35  ;;  %v1566_v35 = vld [vmem:[#allocation7 + $0x360] sm:$0xff] }
 0x203   : > { %1656 = vmatprep.subr.mxu0 %v1495_v36  ;;  %1720 = vmatpush2.msra.mxu1 %v1566_v35  ;;  %v1565_v36 = vld [vmem:[#allocation7 + $0x358] sm:$0xff] }
 0x204   : > { %1657 = vmatpush2.msra.mxu0 %v1494_v37  ;;  %1721 = vmatprep.subr.mxu1 %v1565_v36  ;;  %v1564_v37 = vld [vmem:[#allocation7 + $0x350] sm:$0xff] }
 0x205   : > { %1658 = vmatprep.subr.mxu0 %v1493_v38  ;;  %v1004_v38 = vrot.slane %v2380_v34, %v2347_v25  ;;  %1722 = vmatpush2.msra.mxu1 %v1564_v37 }
 0x206   : > { %1659 = vmatpush2.msra.mxu0 %v1492_v39  ;;  %v1563_v39 = vld [vmem:[#allocation7 + $0x348] sm:$0xff] }
 0x207   : > { %1660 = vmatprep.subr.mxu0 %v1491_v40  ;;  %1723 = vmatprep.subr.mxu1 %v1563_v39  ;;  %v1562_v40 = vld [vmem:[#allocation7 + $0x340] sm:$0xff] }
 0x208   : > { %1661 = vmatpush2.msra.mxu0 %v1490_v41  ;;  %v1008_v41 = vrot.slane %v2380_v34, %v2341_v21  ;;  %1724 = vmatpush2.msra.mxu1 %v1562_v40  ;;  %v2396_v39 = vld [vmem:[%s2456_s5] sm:$0xf] }
 0x209   : > { %1725 = vmatprep.subr.mxu1 %v1561_v42  ;;  %v2401_v40 = vld [vmem:[%s2457_s6] sm:$0xf] }
 0x20a   : > { %1726 = vmatpush2.msra.mxu1 %v1560_v43  ;;  %v1403_v43 = vrot.slane %v2396_v39, %v2341_v21 }
 0x20b   : > { %1727 = vmatprep.subr.mxu1 %v1559_v13  ;;  %v1425_v13 = vrot.slane %v2401_v40, %v2347_v25 }
 0x20c   : > { %1728 = vmatpush2.msra.mxu1 %v1558_v11 }
 0x20d   : > { %1729 = vmatprep.subr.mxu1 %v1557_v44 }
 0x20e   : > { %1730 = vmatpush2.msra.mxu1 %v1556_v12 }
 0x20f   : > { %1731 = vmatprep.subr.mxu1 %v1555_v51 }
 0x210   : > { %1732 = vmatpush2.msra.mxu1 %v1554_v53 }
 0x246   : > { %v1087_v9 = vpop.f32.mrf.mxu0 }
 0x247   : > { %v1088_v16 = vadd.f32 %v1087_v9, %v1004_v38 }
 0x248   : > { %v1158_v45 = vpop.f32.mrf.mxu1  ;;  %v1089_v48 = vpop.f32.mrf.mxu0 }
 0x249   : > { %v1159_v49 = vadd.f32 %v1158_v45, %v1088_v16  ;;  %v1090_v50 = vadd.f32 %v1089_v48, %v1008_v41  ;;  %v1399_v41 = vrot.slane %v2396_v39, %v2347_v25  ;;  %v1429_v45 = vrot.slane %v2401_v40, %v2341_v21 }
 0x24a   : > { %v1160_v52 = vpop.f32.mrf.mxu1 }
 0x24b   : > { %v1310_v54 = vmul.f32 %v2387_v47, %v1159_v49  ;;  %v1161_v55 = vadd.f32 %v1160_v52, %v1090_v50  ;;  %v1016_v52 = vrot.slane %v2380_v34, %v2350_v28 }
 0x24d   : > { %v1314_v56 = vrot.slane %v1310_v54, 4  ;;  %v1311_v57 = vmul.f32 %v2387_v47, %v1161_v55 }
 0x24f   : > { %v1315_v58 = vadd.f32 %v1314_v56, %v1310_v54  ;;  %v1320_v59 = vrot.slane %v1311_v57, 4 }
 0x251   : > { %v1316_v60 = vrot.slane %v1315_v58, 2  ;;  %v1321_v61 = vadd.f32 %v1320_v59, %v1311_v57 }
 0x253   : > { %v1317_v62 = vadd.f32 %v1316_v60, %v1315_v58  ;;  %v1322_v63 = vrot.slane %v1321_v61, 2 }
 0x255   : > { %v1318_v0 = vrot.slane %v1317_v62, 1  ;;  %v1323_v1 = vadd.f32 %v1322_v63, %v1321_v61 }
 0x257   : > { %v1319_v2 = vadd.f32 %v1318_v0, %v1317_v62  ;;  %v1324_v3 = vrot.slane %v1323_v1, 1 }
 0x259   : > { %v1338_v4 = vmul.f32 0.25, %v1319_v2  ;;  %v1325_v5 = vadd.f32 %v1324_v3, %v1323_v1 }
 0x25b   : > { %v1342_v6 = vsub.f32 %v1159_v49, %v1338_v4  ;;  %v1339_v7 = vmul.f32 0.25, %v1325_v5  ;;  %v1012_v49 = vrot.slane %v2380_v34, %v2353_v31 }
 0x25d   : > { %v1346_v8 = vmul.f32 %v2387_v47, %v1342_v6  ;;  %v1343_v10 = vsub.f32 %v1161_v55, %v1339_v7 }
 0x25f   : > { %v1350_v14 = vmul.f32 %v1346_v8, %v1346_v8  ;;  %v1347_v15 = vmul.f32 %v2387_v47, %v1343_v10 }
 0x261   : > { %v1354_v17 = vrot.slane %v1350_v14, 4  ;;  %v1351_v18 = vmul.f32 %v1347_v15, %v1347_v15 }
 0x263   : > { %v1355_v19 = vadd.f32 %v1354_v17, %v1350_v14  ;;  %v1360_v20 = vrot.slane %v1351_v18, 4 }
 0x265   : > { %v1356_v22 = vrot.slane %v1355_v19, 2  ;;  %v1361_v23 = vadd.f32 %v1360_v20, %v1351_v18 }
 0x267   : > { %v1357_v24 = vadd.f32 %v1356_v22, %v1355_v19  ;;  %v1362_v26 = vrot.slane %v1361_v23, 2 }
 0x269   : > { %v1358_v27 = vrot.slane %v1357_v24, 1  ;;  %v1363_v29 = vadd.f32 %v1362_v26, %v1361_v23 }
 0x26b   : > { %v1359_v30 = vadd.f32 %v1358_v27, %v1357_v24  ;;  %v1364_v32 = vrot.slane %v1363_v29, 1 }
 0x26d   : > { %v1378_v33 = vmul.f32 0.25, %v1359_v30  ;;  %v1365_v35 = vadd.f32 %v1364_v32, %v1363_v29 }
 0x26f   : > { %v1382_v36 = vadd.f32 1e-05, %v1378_v33  ;;  %v1379_v37 = vmul.f32 0.25, %v1365_v35 }
 0x271   : > { %1976 = vrsqrt.f32 %v1382_v36  ;;  %v1383_v38 = vadd.f32 1e-05, %v1379_v37 }
 0x273   : > { %1978 = vrsqrt.f32 %v1383_v38 }
 0x27e   : > { %v1977_v42 = vpop.eup %1976 }
 0x27f   : > { %v1390_v9 = vmul.f32 %v1977_v42, %v1342_v6 }
 0x280   : > { %v1979_v11 = vpop.eup %1978 }
 0x281   : > { %v1416_v16 = vmul.f32 %v1399_v41, %v1390_v9  ;;  %v1391_v44 = vmul.f32 %v1979_v11, %v1343_v10 }
 0x283   : > { %v1417_v46 = vmul.f32 %v1403_v43, %v1391_v44  ;;  %v1442_v48 = vadd.f32 %v1425_v13, %v1416_v16 }
 0x285   : > { %v1443_v12 = vadd.f32 %v1429_v45, %v1417_v46  ;;  %v1450_v50 = vmul.f32 0.2, %v1442_v48  ;;  %vm1446_vm6 = vcmp.gt.f32.partialorder %v1442_v48, 0.0  ;;  %v1411_v46 = vrot.slane %v2396_v39, %v2350_v28 }
 0x287   : > { %vm1447_vm5 = vcmp.gt.f32.partialorder %v1443_v12, 0.0  ;;  %v1451_v51 = vmul.f32 0.2, %v1443_v12  ;;  %v1454_v57 = vsel %vm1446_vm6, %v1442_v48, %v1450_v50  ;;  %v1433_v48 = vrot.slane %v2401_v40, %v2353_v31 }
 0x288   : > { %v1229_v53 = vpop.f32.mrf.mxu0 }
 0x289   : > { %v1300_v54 = vpop.f32.mrf.mxu1  ;;  %v1455_v55 = vsel %vm1447_vm5, %v1443_v12, %v1451_v51  ;;  %v1230_v56 = vadd.f32 %v1229_v53, %v1012_v49  ;;  %v1437_v51 = vrot.slane %v2401_v40, %v2350_v28 }
 0x28a   : > { %1662 = vmatprep.mubr.f32.mxu0 %v1455_v55  ;;  %v1231_v58 = vpop.f32.mrf.mxu0 }
 0x28b   : > { %1663 = vmatmul.mubr.f32.vlgmr.msra.gmra.mxu0 %v1454_v57  ;;  %v1301_v59 = vadd.f32 %v1300_v54, %v1230_v56  ;;  %v1232_v60 = vadd.f32 %v1231_v58, %v1016_v52  ;;  %v1302_v61 = vpop.f32.mrf.mxu1 }
 0x28d   : > { %v1312_v62 = vmul.f32 %v2387_v47, %v1301_v59  ;;  %v1303_v63 = vadd.f32 %v1302_v61, %v1232_v60 }
 0x28f   : > { %v1326_v0 = vrot.slane %v1312_v62, 4  ;;  %v1313_v1 = vmul.f32 %v2387_v47, %v1303_v63 }
 0x291   : > { %v1327_v2 = vadd.f32 %v1326_v0, %v1312_v62  ;;  %v1332_v3 = vrot.slane %v1313_v1, 4 }
 0x293   : > { %v1328_v34 = vrot.slane %v1327_v2, 2  ;;  %v1333_v4 = vadd.f32 %v1332_v3, %v1313_v1 }
 0x295   : > { %v1329_v5 = vadd.f32 %v1328_v34, %v1327_v2  ;;  %v1334_v6 = vrot.slane %v1333_v4, 2  ;;  %v1743_v2 = vld [vmem:[%s2460_s9] sm:$0xff] }
 0x297   : > { %v1330_v7 = vrot.slane %v1329_v5, 1  ;;  %v1335_v8 = vadd.f32 %v1334_v6, %v1333_v4 }
 0x299   : > { %v1331_v10 = vadd.f32 %v1330_v7, %v1329_v5  ;;  %v1336_v14 = vrot.slane %v1335_v8, 1 }
 0x29b   : > { %v1340_v15 = vmul.f32 0.25, %v1331_v10  ;;  %v1337_v17 = vadd.f32 %v1336_v14, %v1335_v8 }
 0x29d   : > { %v1344_v18 = vsub.f32 %v1301_v59, %v1340_v15  ;;  %v1341_v19 = vmul.f32 0.25, %v1337_v17 }
 0x29f   : > { %v1348_v20 = vmul.f32 %v2387_v47, %v1344_v18  ;;  %v1345_v22 = vsub.f32 %v1303_v63, %v1341_v19 }
 0x2a1   : > { %v1352_v23 = vmul.f32 %v1348_v20, %v1348_v20  ;;  %v1349_v24 = vmul.f32 %v2387_v47, %v1345_v22  ;;  %v1407_v47 = vrot.slane %v2396_v39, %v2353_v31  ;;  %v1586_v31 = vld [vmem:[%s2459_s8] sm:$0x3] }
 0x2a2   : > { %v1595_v59 = vrot.slane %v1586_v31, %v2341_v21  ;;  %v1591_v1 = vrot.slane %v1586_v31, %v2347_v25 }
 0x2a3   : > { %v1366_v26 = vrot.slane %v1352_v23, 4  ;;  %v1353_v27 = vmul.f32 %v1349_v24, %v1349_v24 }
 0x2a5   : > { %v1367_v29 = vadd.f32 %v1366_v26, %v1352_v23  ;;  %v1372_v30 = vrot.slane %v1353_v27, 4 }
 0x2a7   : > { %v1368_v32 = vrot.slane %v1367_v29, 2  ;;  %v1373_v33 = vadd.f32 %v1372_v30, %v1353_v27 }
 0x2a9   : > { %v1369_v35 = vadd.f32 %v1368_v32, %v1367_v29  ;;  %v1374_v36 = vrot.slane %v1373_v33, 2 }
 0x2ab   : > { %v1370_v37 = vrot.slane %v1369_v35, 1  ;;  %v1375_v38 = vadd.f32 %v1374_v36, %v1373_v33 }
 0x2ad   : > { %v1371_v41 = vadd.f32 %v1370_v37, %v1369_v35  ;;  %v1376_v42 = vrot.slane %v1375_v38, 1 }
 0x2af   : > { %v1380_v9 = vmul.f32 0.25, %v1371_v41  ;;  %v1377_v43 = vadd.f32 %v1376_v42, %v1375_v38 }
 0x2b1   : > { %v1384_v13 = vadd.f32 1e-05, %v1380_v9  ;;  %v1381_v11 = vmul.f32 0.25, %v1377_v43 }
 0x2b3   : > { %1980 = vrsqrt.f32 %v1384_v13  ;;  %v1385_v16 = vadd.f32 1e-05, %v1381_v11 }
 0x2b5   : > { %1982 = vrsqrt.f32 %v1385_v16 }
 0x2c0   : > { %v1981_v44 = vpop.eup %1980 }
 0x2c1   : > { %v1392_v45 = vmul.f32 %v1981_v44, %v1344_v18 }
 0x2c2   : > { %v1983_v12 = vpop.eup %1982 }
 0x2c3   : > { %v1418_v49 = vmul.f32 %v1407_v47, %v1392_v45  ;;  %v1393_v50 = vmul.f32 %v1983_v12, %v1345_v22 }
 0x2c5   : > { %v1419_v52 = vmul.f32 %v1411_v46, %v1393_v50  ;;  %v1444_v53 = vadd.f32 %v1433_v48, %v1418_v49 }
 0x2c7   : > { %v1445_v54 = vadd.f32 %v1437_v51, %v1419_v52  ;;  %v1452_v55 = vmul.f32 0.2, %v1444_v53  ;;  %vm1448_vm8 = vcmp.gt.f32.partialorder %v1444_v53, 0.0 }
 0x2c9   : > { %vm1449_vm7 = vcmp.gt.f32.partialorder %v1445_v54, 0.0  ;;  %v1453_v56 = vmul.f32 0.2, %v1445_v54  ;;  %v1456_v58 = vsel %vm1448_vm8, %v1444_v53, %v1452_v55 }
 0x2cb   : > { %v1457_v57 = vsel %vm1449_vm7, %v1445_v54, %v1453_v56 }
 0x2cc   : > { %1733 = vmatprep.mubr.f32.mxu1 %v1457_v57 }
 0x2cd   : > { %1734 = vmatmul.mubr.f32.vlgmr.msra.gmra.mxu1 %v1456_v58 }
 0x34b   : > { %v1664_v39 = vpop.f32.mrf.mxu0 }
 0x34c   : > { %v1665_v3 = vadd.f32 %v1664_v39, %v1591_v1 }
 0x34d   : > { %v1666_v60 = vpop.f32.mrf.mxu0 }
 0x34e   : > { %v1667_v40 = vadd.f32 %v1666_v60, %v1595_v59 }
 0x38d   : > { %v1735_v28 = vpop.f32.mrf.mxu1 }
 0x38e   : > { %v1736_v4 = vadd.f32 %v1735_v28, %v1665_v3 }
 0x38f   : > { %v1737_v61 = vpop.f32.mrf.mxu1 }
 0x390   : > { %v1738_v62 = vadd.f32 %v1737_v61, %v1667_v40 }
 0x392   : > { %v1740_v63 = vmul.f32 0.5, %v1738_v62 }
 0x394   : > { %v1741_v0 = vmul.f32 1.442695, %v1740_v63 }
 0x396   : > { %1984 = vpow2.f32 %v1741_v0 }
 0x3a3   : > { %v1985_v34 = vpop.eup %1984 }
 0x3a4   : > { %v1744_v5 = vmul.f32 %v1985_v34, %v1743_v2 }
 0x3a6   : > { %v1745_v6 = vadd.f32 %v1744_v5, %v1736_v4 }
 0x3a8   : > { %1746 = vst [vmem:[%s2461_s10] sm:$0xff] %v1745_v6 }
 0x3a9 PF: > { %p21_p12 = scmp.ge.s32.totalorder %s2237_s21, 4   ;;  %s2478_s13 = smov %s2096_s14 }
 0x3aa   : > { %s2479_s14 = smov %s2100_s15  ;;  %s2480_s15 = smov %s2246_s26 }
 0x3ab   : > { %s2481_s16 = smov %s2237_s21  ;;  %23 = sbr.rel (!%p21_p12) target bundleno = 4 (0x4), region = 113 }
 0x3b0   :  { %1758 = vsyncpa [#allocation4], 1 }
 0x3b1   :  { %1760 = vsyncpa [#allocation4 + $0x1], 1 }
 0x3b2   :  { %1761 = vsyncpa [#allocation6], 1 }

</bundles_post_ra>
